<compile_context>
chip_gen: v7x
topology: tpu7x:2x2x1
jax: 0.10.0
libtpu: 0.0.40
codegen_flags: <defaults>
</compile_context>

<pallas_src>
import functools

import jax
import jax.numpy as jnp
from jax import lax
from jax.experimental import pallas as pl
from jax.experimental.pallas import tpu as pltpu

# ---------------- model dimensions (toy) ----------------
B, K, D = 2, 8, 16       # batch, num_objs, obj_dim
T, E = 8, 16             # seq_length, word-embedding dim
H = 32                   # hidden dim (q_emb / FCNet width; 1024 in the real model)
A = 16                   # number of answer classes
V = 50                   # vocab size
BP = 8                   # padded batch rows per GRU step (sublane-aligned slices)

assert K & (K - 1) == 0, "one-hot att relayout uses r & (K-1); use r % K for non-pow2 K"

# ---------------- packed-slab layout ----------------
# weight slab (bf16, 128 lanes wide); every row offset is a multiple of 16 (bf16 tile).
R_WX3 = 0                # [E, 3H]  GRU input proj  (wxr|wxz|wxn)
R_WH3 = R_WX3 + E        # [H, 3H]  GRU hidden proj (whr|whz|whn)
R_WVA = R_WH3 + H        # [D, H]   v_att v-projection
R_WQA = R_WVA + D        # [H, H]   v_att q-projection
R_WQN = R_WQA + H        # [H, H]   q_net
R_WVN = R_WQN + H        # [D, H]   v_net
R_WC1 = R_WVN + D        # [H, 2A]  classifier | c_1
R_W2 = R_WC1 + H         # [A, A]   c_2
R_WACOL = R_W2 + A       # [H, 1]   v_att final projection (wa^T)
W_ROWS = R_WACOL + H     # 224 rows total

# bias slab (f32, 128 lanes wide): one bias per row.
BR_X3, BR_HN, BR_VA, BR_QA, BR_A, BR_QN, BR_VN, BR_C1, BR_2 = range(9)
B_ROWS = 16

# aux slab (f32): rows 0:B -> v_mask [B,K]; rows AUX_LBL:AUX_LBL+B -> labels [B,A]
AUX_ROWS = 8
AUX_LBL = 4

# output slab (f32): rows 0:B logits [B,A]; rows B:2B att [B,K]; element (2B,0) loss
OUT_ROWS = 8

# rough advisory cost for XLA's scheduler
_FLOPS = (2 * (T * BP) * E * 3 * H + T * (2 * BP * H * 3 * H + BP * 3 * H * 8)
          + 2 * B * K * D * H + 2 * B * H * H + B * K * H + 2 * B * K * H
          + B * K * K + 2 * B * K * D + 2 * B * H * H + 2 * B * D * H
          + 2 * (2 * B) * H * (2 * A) + 2 * B * A * A)
_TRANS = T * BP * 3 * H + B * K + 4 * B * A
_BYTES = (T * BP * E * 2 + B * K * D * 4 + AUX_ROWS * 128 * 4
          + W_ROWS * 128 * 2 + B_ROWS * 128 * 4 + OUT_ROWS * 128 * 4)


def rubi_kernel(we_ref, v_ref, aux_ref, w_ref, b_ref, out_ref, *, compute_loss):
    f32, bf16 = jnp.float32, jnp.bfloat16
    H3 = 3 * H

    v = v_ref[...]                                   # [B, K, D] f32
    mask = aux_ref[0:B, 0:K]                         # [B, K]    f32

    # ---- biases (single [16,128] f32 slab, one row each) --------------------------
    bx3 = b_ref[BR_X3:BR_X3 + 1, 0:H3]
    bhn = b_ref[BR_HN:BR_HN + 1, 0:H]
    bva = b_ref[BR_VA:BR_VA + 1, 0:H]
    bqa = b_ref[BR_QA:BR_QA + 1, 0:H]
    ba = b_ref[BR_A:BR_A + 1, 0:1]
    bqn = b_ref[BR_QN:BR_QN + 1, 0:H]
    bvn = b_ref[BR_VN:BR_VN + 1, 0:H]
    bc1 = b_ref[BR_C1:BR_C1 + 1, 0:2 * A]
    b2 = b_ref[BR_2:BR_2 + 1, 0:A]

    # ---- q_emb: single-layer GRU (last hidden state) ------------------------------
    # Hoisted fused input projection for ALL timesteps: [T*BP, E] @ [E, 3H] (r|z|n).
    wx3 = w_ref[R_WX3:R_WX3 + E, 0:H3]
    wh3 = w_ref[R_WH3:R_WH3 + H, 0:H3]
    x_proj = jnp.dot(we_ref[...], wx3, preferred_element_type=f32) + bx3     # [T*BP, 3H]

    # TODO(synk): hold wh3 in the MXU across steps (matmul_push_rhs/acc_lhs/pop) to drop
    # the per-step RHS push from the serial recurrence.
    h = jnp.zeros((BP, H), f32)
    for t in range(T):                               # static unroll (T=8)
        xp = x_proj[t * BP:(t + 1) * BP, :]          # [BP, 3H] tile-aligned slice
        hp = jnp.dot(h.astype(bf16), wh3, preferred_element_type=f32)        # [BP, 3H]
        r = jax.nn.sigmoid(xp[:, 0:H] + hp[:, 0:H])
        z = jax.nn.sigmoid(xp[:, H:2 * H] + hp[:, H:2 * H])
        n = jnp.tanh(xp[:, 2 * H:3 * H] + r * (hp[:, 2 * H:3 * H] + bhn))
        h = (1.0 - z) * n + z * h
    q_emb = h[0:B, :]                                # [B, H]  (rows >= B were padding)
    q_emb_b = q_emb.astype(bf16)

    # ---- v_att: project v and q, elementwise product, MXU dot against wa ----------
    wva = w_ref[R_WVA:R_WVA + D, 0:H]
    wqa = w_ref[R_WQA:R_WQA + H, 0:H]
    wa_col = w_ref[R_WACOL:R_WACOL + H, 0:1]                                 # [H, 1]
    v_flat = v.reshape(B * K, D)
    v_proj = jax.nn.relu(jnp.dot(v_flat.astype(bf16), wva,
                                 preferred_element_type=f32) + bva)          # [B*K, H]
    q_proj = jax.nn.relu(jnp.dot(q_emb_b, wqa,
                                 preferred_element_type=f32) + bqa)          # [B, H]
    joint = v_proj.reshape(B, K, H) * q_proj[:, None, :]                     # [B, K, H]
    # H-reduction on the MXU instead of an XLU lane reduce:
    att_col = jnp.dot(joint.reshape(B * K, H).astype(bf16), wa_col,
                      preferred_element_type=f32)                            # [B*K, 1]
    # relayout [B*K,1] -> lane-major [B,K] via an iota one-hot + leading-dim reshape
    r_idx = lax.broadcasted_iota(jnp.int32, (B * K, K), 0)
    k_idx = lax.broadcasted_iota(jnp.int32, (B * K, K), 1)
    onehot = ((r_idx & (K - 1)) == k_idx).astype(f32)                        # [B*K, K]
    att_logits = jnp.sum((att_col * onehot).reshape(B, K, K), axis=1) + ba   # [B, K]

    # ---- mask_softmax (matches reference exactly: GLOBAL max, epsilon 1e-5) -------
    x2 = jnp.exp(att_logits - jnp.max(att_logits))
    x3 = x2 * mask
    x3_sum = jnp.sum(x3, axis=1, keepdims=True) + 1e-5
    att = x3 * pl.reciprocal(x3_sum, approx=True)                            # [B, K]

    # ---- attended visual feature: MXU batched contraction over K ------------------
    v_emb3 = jnp.einsum('bxk,bkd->bxd', att[:, None, :], v,
                        preferred_element_type=f32)                          # [B, 1, D]
    v_emb = jnp.sum(v_emb3, axis=1)                                          # [B, D] (axis size 1)

    # ---- q_net / v_net (Linear + ReLU), joint fusion -------------------------------
    wqn = w_ref[R_WQN:R_WQN + H, 0:H]
    wvn = w_ref[R_WVN:R_WVN + D, 0:H]
    q_repr = jax.nn.relu(jnp.dot(q_emb_b, wqn, preferred_element_type=f32) + bqn)
    v_repr = jax.nn.relu(jnp.dot(v_emb.astype(bf16), wvn,
                                 preferred_element_type=f32) + bvn)
    joint_repr = q_repr * v_repr                                             # [B, H]

    # ---- classifier + c_1 (q_emb.detach() is a forward no-op) ---------------------
    wc1 = w_ref[R_WC1:R_WC1 + H, 0:2 * A]
    if A < 128:
        # fused [joint_repr ; q_emb] @ [wc | w1]: one matmul while both outputs are
        # narrower than a lane tile.
        cls_lhs = jnp.concatenate([joint_repr, q_emb], axis=0).astype(bf16)  # [2B, H]
        cls_out = jnp.dot(cls_lhs, wc1, preferred_element_type=f32) + bc1    # [2B, 2A]
        logits = cls_out[0:B, 0:A]
        q_pred = cls_out[B:2 * B, A:2 * A]
    else:
        # at production A (>=128) both outputs are lane-dense; fusing doubles MXU FLOPs
        logits = jnp.dot(joint_repr.astype(bf16), wc1[:, 0:A],
                         preferred_element_type=f32) + bc1[:, 0:A]
        q_pred = jnp.dot(q_emb_b, wc1[:, A:2 * A],
                         preferred_element_type=f32) + bc1[:, A:2 * A]

    # ---- loss (statically skipped in the inference variant) -----------------------
    if compute_loss:
        labels = aux_ref[AUX_LBL:AUX_LBL + B, 0:A]                           # [B, A]
        w2 = w_ref[R_W2:R_W2 + A, 0:A]
        q_out = jnp.dot(q_pred.astype(bf16), w2, preferred_element_type=f32) + b2
        rubi_logits = logits * jax.nn.sigmoid(q_pred)

        def bce(x, y):   # BCE-with-logits, mean reduction
            return jnp.mean(jnp.maximum(x, 0.0) - x * y
                            + jnp.log(1.0 + jnp.exp(-jnp.abs(x))))

        loss = (bce(rubi_logits, labels) + bce(q_out, labels)) * float(A)
        lane0 = (lax.broadcasted_iota(jnp.int32, (1, 128), 1) == 0).astype(f32)
        loss_row = loss * lane0                                              # [1, 128]
    else:
        loss_row = jnp.zeros((1, 128), f32)

    # ---- single lane-dense output slab (one unmasked [8,128] store) ---------------
    row_logits = jnp.concatenate([logits, jnp.zeros((B, 128 - A), f32)], axis=1)
    row_att = jnp.concatenate([att, jnp.zeros((B, 128 - K), f32)], axis=1)
    pad_rows = jnp.zeros((OUT_ROWS - 2 * B - 1, 128), f32)
    out_ref[...] = jnp.concatenate([row_logits, row_att, loss_row, pad_rows], axis=0)


def init_params(key):
    keys = jax.random.split(key, 27)

    def w(k, shape, scale=0.1):
        return (scale * jax.random.normal(k, shape)).astype(jnp.float32)

    return dict(
        emb=w(keys[0], (V, E)),
        # GRU (gates split: reset, update, new)
        wxr=w(keys[1], (E, H)), wxz=w(keys[2], (E, H)), wxn=w(keys[3], (E, H)),
        whr=w(keys[4], (H, H)), whz=w(keys[5], (H, H)), whn=w(keys[6], (H, H)),
        br=w(keys[7], (1, H)), bz=w(keys[8], (1, H)), bxn=w(keys[9], (1, H)), bhn=w(keys[10], (1, H)),
        # v_att
        wva=w(keys[11], (D, H)), bva=w(keys[12], (1, H)),
        wqa=w(keys[13], (H, H)), bqa=w(keys[14], (1, H)),
        wa=w(keys[15], (1, H)), ba=w(keys[16], (1, 1)),
        # q_net / v_net
        wqn=w(keys[17], (H, H)), bqn=w(keys[18], (1, H)),
        wvn=w(keys[19], (D, H)), bvn=w(keys[20], (1, H)),
        # classifier, c_1, c_2
        wc=w(keys[21], (H, A)), bc=w(keys[22], (1, A)),
        w1=w(keys[23], (H, A)), b1=w(keys[24], (1, A)),
        w2=w(keys[25], (A, A)), b2=w(keys[26], (1, A)),
    )


def pack_params(params):
    """One-time fusion of all linear weights/biases into two lane-dense slabs."""
    bf16, f32 = jnp.bfloat16, jnp.float32

    def put(slab, row, mat, dtype):
        mat = jnp.asarray(mat).astype(dtype)
        return slab.at[row:row + mat.shape[0], 0:mat.shape[1]].set(mat)

    wslab = jnp.zeros((W_ROWS, 128), bf16)
    wx3 = jnp.concatenate([params['wxr'], params['wxz'], params['wxn']], axis=1)
    wh3 = jnp.concatenate([params['whr'], params['whz'], params['whn']], axis=1)
    wc1 = jnp.concatenate([params['wc'], params['w1']], axis=1)
    for row, mat in ((R_WX3, wx3), (R_WH3, wh3), (R_WVA, params['wva']),
                     (R_WQA, params['wqa']), (R_WQN, params['wqn']),
                     (R_WVN, params['wvn']), (R_WC1, wc1), (R_W2, params['w2']),
                     (R_WACOL, params['wa'].T)):
        wslab = put(wslab, row, mat, bf16)

    bslab = jnp.zeros((B_ROWS, 128), f32)
    bx3 = jnp.concatenate([params['br'], params['bz'], params['bxn']], axis=1)
    bc1 = jnp.concatenate([params['bc'], params['b1']], axis=1)
    for row, vec in ((BR_X3, bx3), (BR_HN, params['bhn']), (BR_VA, params['bva']),
                     (BR_QA, params['bqa']), (BR_A, params['ba']), (BR_QN, params['bqn']),
                     (BR_VN, params['bvn']), (BR_C1, bc1), (BR_2, params['b2'])):
        bslab = put(bslab, row, vec, f32)

    return dict(emb=params['emb'], wslab=wslab, bslab=bslab)


def _vmem_limit_bytes():
    # size the scoped-VMEM budget per generation (v5e/v6e 128 MiB phys, v7x 64 MiB)
    try:
        return int(min(pltpu.get_tpu_info().vmem_capacity_bytes // 2, 64 * 1024 * 1024))
    except Exception:
        return 32 * 1024 * 1024


@functools.partial(jax.jit, static_argnames=("compute_loss",))
def _rubi_forward(packed, v, q, labels, v_mask, compute_loss):
    f32, bf16 = jnp.float32, jnp.bfloat16

    # word-embedding gather (kept in XLA) + time-major layout, batch rows padded to BP
    w_emb = jnp.take(packed['emb'], q, axis=0)                     # [B, T, E]
    we = jnp.transpose(w_emb, (1, 0, 2)).astype(bf16)              # [T, B, E]
    we2d = jnp.zeros((T, BP, E), bf16).at[:, 0:B, :].set(we).reshape(T * BP, E)

    if v_mask is None:
        # TODO(synk): unmasked path uses mask_softmax with an all-ones mask, which differs
        # from F.softmax(att, 1) only by the 1e-5 epsilon in the denominator.
        v_mask = jnp.ones((B, K), f32)
    aux = jnp.zeros((AUX_ROWS, 128), f32).at[0:B, 0:K].set(v_mask.astype(f32))
    if compute_loss:
        aux = aux.at[AUX_LBL:AUX_LBL + B, 0:A].set(labels.astype(f32))

    vspec = pl.BlockSpec(memory_space=pltpu.MemorySpace.VMEM)
    out = pl.pallas_call(
        functools.partial(rubi_kernel, compute_loss=compute_loss),
        out_shape=jax.ShapeDtypeStruct((OUT_ROWS, 128), f32),
        in_specs=[vspec] * 5,
        out_specs=vspec,
        compiler_params=pltpu.CompilerParams(vmem_limit_bytes=_vmem_limit_bytes()),
        cost_estimate=pl.CostEstimate(flops=_FLOPS, transcendentals=_TRANS,
                                      bytes_accessed=_BYTES),
    )(we2d, v.astype(f32), aux, packed['wslab'], packed['bslab'])

    logits = out[0:B, 0:A]
    att = out[B:2 * B, 0:K][:, :, None]                            # [B, K, 1] as in reference
    loss = out[2 * B, 0]
    return logits, loss, att


def base_model_forward(packed, v, q, labels, bias, v_mask, loss_type=None):
    del bias  # only used by the 'lmh_rubi' LearnedMixin branch
    # TODO(synk): loss_type == 'lmh_rubi' needs LearnedMixin(0.36), not defined in the
    # reference; only the default RUBi BCE loss path is implemented.
    compute_loss = labels is not None
    logits, loss, att = _rubi_forward(packed, v, q, labels, v_mask,
                                      compute_loss=compute_loss)
    return logits, (loss if compute_loss else None), att


if __name__ == "__main__":
    root = jax.random.PRNGKey(0)
    kp, kq, kv, kl, kb = jax.random.split(root, 5)

    params = init_params(kp)
    packed = pack_params(params)          # one-time weight fusion / slab packing
    q = jax.random.randint(kq, (B, T), 0, V)                              # [batch, seq_length]
    v = jax.random.normal(kv, (B, K, D), dtype=jnp.float32)               # [batch, num_objs, obj_dim]
    labels = (jax.random.uniform(kl, (B, A)) > 0.7).astype(jnp.float32)   # multi-hot answer labels
    bias = jax.random.uniform(kb, (B, A), dtype=jnp.float32)              # unused (non-lmh path)
    v_mask = jnp.ones((B, K), jnp.float32).at[1, K - 3:].set(0.0)         # mask last 3 objs of item 1

    # training-style call (labels present -> loss computed in-kernel)
    logits, loss, att = base_model_forward(packed, v, q, labels, bias, v_mask)
    jax.block_until_ready(logits)
    jax.block_until_ready(loss)
    jax.block_until_ready(att)
    assert logits.shape == (B, A)
    assert att.shape == (B, K, 1)
    assert loss.shape == ()

    # inference-style call (labels=None -> BCE block statically skipped; softmax w/o mask)
    logits2, loss2, att2 = base_model_forward(packed, v, q, None, bias, None)
    jax.block_until_ready(logits2)
    jax.block_until_ready(att2)
    assert loss2 is None
    assert logits2.shape == (B, A)

    print("KERNEL_OK")
</pallas_src>

<mosaic_0001>
module attributes {stable_mosaic.version = 11 : i64} {
  func.func @rubi_kernel(%arg0: memref<64x16xbf16, #tpu.memory_space<vmem>>, %arg1: memref<2x8x16xf32, #tpu.memory_space<vmem>>, %arg2: memref<8x128xf32, #tpu.memory_space<vmem>>, %arg3: memref<224x128xbf16, #tpu.memory_space<vmem>>, %arg4: memref<16x128xf32, #tpu.memory_space<vmem>>, %arg5: memref<8x128xf32, #tpu.memory_space<vmem>>) attributes {dimension_semantics = [], scalar_prefetch = 0 : i64, scratch_operands = 0 : i64, tpu.core_type = #tpu.core_type<tc>} {
    %c0 = arith.constant 0 : index
    %c0_0 = arith.constant 0 : index
    %c0_1 = arith.constant 0 : index
    %0 = vector.load %arg1[%c0, %c0_0, %c0_1] : memref<2x8x16xf32, #tpu.memory_space<vmem>>, vector<2x8x16xf32>
    %c0_2 = arith.constant 0 : index
    %c0_3 = arith.constant 0 : index
    %1 = vector.load %arg2[%c0_2, %c0_3] : memref<8x128xf32, #tpu.memory_space<vmem>>, vector<2x8xf32>
    %c0_4 = arith.constant 0 : index
    %c0_5 = arith.constant 0 : index
    %2 = vector.load %arg4[%c0_4, %c0_5] : memref<16x128xf32, #tpu.memory_space<vmem>>, vector<1x96xf32>
    %c1 = arith.constant 1 : index
    %c0_6 = arith.constant 0 : index
    %3 = vector.load %arg4[%c1, %c0_6] : memref<16x128xf32, #tpu.memory_space<vmem>>, vector<1x32xf32>
    %c2 = arith.constant 2 : index
    %c0_7 = arith.constant 0 : index
    %4 = vector.load %arg4[%c2, %c0_7] : memref<16x128xf32, #tpu.memory_space<vmem>>, vector<1x32xf32>
    %c3 = arith.constant 3 : index
    %c0_8 = arith.constant 0 : index
    %5 = vector.load %arg4[%c3, %c0_8] : memref<16x128xf32, #tpu.memory_space<vmem>>, vector<1x32xf32>
    %c4 = arith.constant 4 : index
    %c0_9 = arith.constant 0 : index
    %6 = vector.load %arg4[%c4, %c0_9] : memref<16x128xf32, #tpu.memory_space<vmem>>, vector<1x1xf32>
    %c5 = arith.constant 5 : index
    %c0_10 = arith.constant 0 : index
    %7 = vector.load %arg4[%c5, %c0_10] : memref<16x128xf32, #tpu.memory_space<vmem>>, vector<1x32xf32>
    %c6 = arith.constant 6 : index
    %c0_11 = arith.constant 0 : index
    %8 = vector.load %arg4[%c6, %c0_11] : memref<16x128xf32, #tpu.memory_space<vmem>>, vector<1x32xf32>
    %c7 = arith.constant 7 : index
    %c0_12 = arith.constant 0 : index
    %9 = vector.load %arg4[%c7, %c0_12] : memref<16x128xf32, #tpu.memory_space<vmem>>, vector<1x32xf32>
    %c8 = arith.constant 8 : index
    %c0_13 = arith.constant 0 : index
    %10 = vector.load %arg4[%c8, %c0_13] : memref<16x128xf32, #tpu.memory_space<vmem>>, vector<1x16xf32>
    %c0_14 = arith.constant 0 : index
    %c0_15 = arith.constant 0 : index
    %11 = vector.load %arg3[%c0_14, %c0_15] : memref<224x128xbf16, #tpu.memory_space<vmem>>, vector<16x96xbf16>
    %c16 = arith.constant 16 : index
    %c0_16 = arith.constant 0 : index
    %12 = vector.load %arg3[%c16, %c0_16] : memref<224x128xbf16, #tpu.memory_space<vmem>>, vector<32x96xbf16>
    %c0_17 = arith.constant 0 : index
    %c0_18 = arith.constant 0 : index
    %13 = vector.load %arg0[%c0_17, %c0_18] : memref<64x16xbf16, #tpu.memory_space<vmem>>, vector<64x16xbf16>
    %cst = arith.constant dense<0.000000e+00> : vector<64x96xf32>
    %14 = tpu.matmul %13, %11, %cst {dimension_numbers = #tpu.dot_dimension_numbers<[1], [0], [0], [1], [0, 0, 1, 1], [], []>} : vector<64x16xbf16>, vector<16x96xbf16>, vector<64x96xf32> -> vector<64x96xf32>
    %15 = vector.broadcast %2 : vector<1x96xf32> to vector<64x96xf32>
    %16 = arith.addf %14, %15 : vector<64x96xf32>
    %cst_19 = arith.constant 0.000000e+00 : f32
    %17 = vector.broadcast %cst_19 : f32 to vector<8x32xf32>
    %18 = vector.extract_strided_slice %16 {offsets = [0, 0], sizes = [8, 96], strides = [1, 1]} : vector<64x96xf32> to vector<8x96xf32>
    %19 = arith.truncf %17 : vector<8x32xf32> to vector<8x32xbf16>
    %cst_20 = arith.constant dense<0.000000e+00> : vector<8x96xf32>
    %20 = tpu.matmul %19, %12, %cst_20 {dimension_numbers = #tpu.dot_dimension_numbers<[1], [0], [0], [1], [0, 0, 1, 1], [], []>} : vector<8x32xbf16>, vector<32x96xbf16>, vector<8x96xf32> -> vector<8x96xf32>
    %21 = vector.extract_strided_slice %18 {offsets = [0, 0], sizes = [8, 32], strides = [1, 1]} : vector<8x96xf32> to vector<8x32xf32>
    %22 = vector.extract_strided_slice %20 {offsets = [0, 0], sizes = [8, 32], strides = [1, 1]} : vector<8x96xf32> to vector<8x32xf32>
    %23 = arith.addf %21, %22 : vector<8x32xf32>
    %24 = arith.negf %23 : vector<8x32xf32>
    %25 = math.exp %24 : vector<8x32xf32>
    %cst_21 = arith.constant 1.000000e+00 : f32
    %26 = vector.broadcast %cst_21 : f32 to vector<8x32xf32>
    %27 = arith.addf %26, %25 : vector<8x32xf32>
    %28 = arith.divf %26, %27 : vector<8x32xf32>
    %29 = vector.extract_strided_slice %18 {offsets = [0, 32], sizes = [8, 32], strides = [1, 1]} : vector<8x96xf32> to vector<8x32xf32>
    %30 = vector.extract_strided_slice %20 {offsets = [0, 32], sizes = [8, 32], strides = [1, 1]} : vector<8x96xf32> to vector<8x32xf32>
    %31 = arith.addf %29, %30 : vector<8x32xf32>
    %32 = arith.negf %31 : vector<8x32xf32>
    %33 = math.exp %32 : vector<8x32xf32>
    %cst_22 = arith.constant 1.000000e+00 : f32
    %34 = vector.broadcast %cst_22 : f32 to vector<8x32xf32>
    %35 = arith.addf %34, %33 : vector<8x32xf32>
    %36 = arith.divf %34, %35 : vector<8x32xf32>
    %37 = vector.extract_strided_slice %18 {offsets = [0, 64], sizes = [8, 32], strides = [1, 1]} : vector<8x96xf32> to vector<8x32xf32>
    %38 = vector.extract_strided_slice %20 {offsets = [0, 64], sizes = [8, 32], strides = [1, 1]} : vector<8x96xf32> to vector<8x32xf32>
    %39 = vector.broadcast %3 : vector<1x32xf32> to vector<8x32xf32>
    %40 = arith.addf %38, %39 : vector<8x32xf32>
    %41 = arith.mulf %28, %40 : vector<8x32xf32>
    %42 = arith.addf %37, %41 : vector<8x32xf32>
    %43 = math.tanh %42 : vector<8x32xf32>
    %cst_23 = arith.constant 1.000000e+00 : f32
    %44 = vector.broadcast %cst_23 : f32 to vector<8x32xf32>
    %45 = arith.subf %44, %36 : vector<8x32xf32>
    %46 = arith.mulf %45, %43 : vector<8x32xf32>
    %47 = arith.mulf %36, %17 : vector<8x32xf32>
    %48 = arith.addf %46, %47 : vector<8x32xf32>
    %49 = vector.extract_strided_slice %16 {offsets = [8, 0], sizes = [8, 96], strides = [1, 1]} : vector<64x96xf32> to vector<8x96xf32>
    %50 = arith.truncf %48 : vector<8x32xf32> to vector<8x32xbf16>
    %cst_24 = arith.constant dense<0.000000e+00> : vector<8x96xf32>
    %51 = tpu.matmul %50, %12, %cst_24 {dimension_numbers = #tpu.dot_dimension_numbers<[1], [0], [0], [1], [0, 0, 1, 1], [], []>} : vector<8x32xbf16>, vector<32x96xbf16>, vector<8x96xf32> -> vector<8x96xf32>
    %52 = vector.extract_strided_slice %49 {offsets = [0, 0], sizes = [8, 32], strides = [1, 1]} : vector<8x96xf32> to vector<8x32xf32>
    %53 = vector.extract_strided_slice %51 {offsets = [0, 0], sizes = [8, 32], strides = [1, 1]} : vector<8x96xf32> to vector<8x32xf32>
    %54 = arith.addf %52, %53 : vector<8x32xf32>
    %55 = arith.negf %54 : vector<8x32xf32>
    %56 = math.exp %55 : vector<8x32xf32>
    %cst_25 = arith.constant 1.000000e+00 : f32
    %57 = vector.broadcast %cst_25 : f32 to vector<8x32xf32>
    %58 = arith.addf %57, %56 : vector<8x32xf32>
    %59 = arith.divf %57, %58 : vector<8x32xf32>
    %60 = vector.extract_strided_slice %49 {offsets = [0, 32], sizes = [8, 32], strides = [1, 1]} : vector<8x96xf32> to vector<8x32xf32>
    %61 = vector.extract_strided_slice %51 {offsets = [0, 32], sizes = [8, 32], strides = [1, 1]} : vector<8x96xf32> to vector<8x32xf32>
    %62 = arith.addf %60, %61 : vector<8x32xf32>
    %63 = arith.negf %62 : vector<8x32xf32>
    %64 = math.exp %63 : vector<8x32xf32>
    %cst_26 = arith.constant 1.000000e+00 : f32
    %65 = vector.broadcast %cst_26 : f32 to vector<8x32xf32>
    %66 = arith.addf %65, %64 : vector<8x32xf32>
    %67 = arith.divf %65, %66 : vector<8x32xf32>
    %68 = vector.extract_strided_slice %49 {offsets = [0, 64], sizes = [8, 32], strides = [1, 1]} : vector<8x96xf32> to vector<8x32xf32>
    %69 = vector.extract_strided_slice %51 {offsets = [0, 64], sizes = [8, 32], strides = [1, 1]} : vector<8x96xf32> to vector<8x32xf32>
    %70 = vector.broadcast %3 : vector<1x32xf32> to vector<8x32xf32>
    %71 = arith.addf %69, %70 : vector<8x32xf32>
    %72 = arith.mulf %59, %71 : vector<8x32xf32>
    %73 = arith.addf %68, %72 : vector<8x32xf32>
    %74 = math.tanh %73 : vector<8x32xf32>
    %cst_27 = arith.constant 1.000000e+00 : f32
    %75 = vector.broadcast %cst_27 : f32 to vector<8x32xf32>
    %76 = arith.subf %75, %67 : vector<8x32xf32>
    %77 = arith.mulf %76, %74 : vector<8x32xf32>
    %78 = arith.mulf %67, %48 : vector<8x32xf32>
    %79 = arith.addf %77, %78 : vector<8x32xf32>
    %80 = vector.extract_strided_slice %16 {offsets = [16, 0], sizes = [8, 96], strides = [1, 1]} : vector<64x96xf32> to vector<8x96xf32>
    %81 = arith.truncf %79 : vector<8x32xf32> to vector<8x32xbf16>
    %cst_28 = arith.constant dense<0.000000e+00> : vector<8x96xf32>
    %82 = tpu.matmul %81, %12, %cst_28 {dimension_numbers = #tpu.dot_dimension_numbers<[1], [0], [0], [1], [0, 0, 1, 1], [], []>} : vector<8x32xbf16>, vector<32x96xbf16>, vector<8x96xf32> -> vector<8x96xf32>
    %83 = vector.extract_strided_slice %80 {offsets = [0, 0], sizes = [8, 32], strides = [1, 1]} : vector<8x96xf32> to vector<8x32xf32>
    %84 = vector.extract_strided_slice %82 {offsets = [0, 0], sizes = [8, 32], strides = [1, 1]} : vector<8x96xf32> to vector<8x32xf32>
    %85 = arith.addf %83, %84 : vector<8x32xf32>
    %86 = arith.negf %85 : vector<8x32xf32>
    %87 = math.exp %86 : vector<8x32xf32>
    %cst_29 = arith.constant 1.000000e+00 : f32
    %88 = vector.broadcast %cst_29 : f32 to vector<8x32xf32>
    %89 = arith.addf %88, %87 : vector<8x32xf32>
    %90 = arith.divf %88, %89 : vector<8x32xf32>
    %91 = vector.extract_strided_slice %80 {offsets = [0, 32], sizes = [8, 32], strides = [1, 1]} : vector<8x96xf32> to vector<8x32xf32>
    %92 = vector.extract_strided_slice %82 {offsets = [0, 32], sizes = [8, 32], strides = [1, 1]} : vector<8x96xf32> to vector<8x32xf32>
    %93 = arith.addf %91, %92 : vector<8x32xf32>
    %94 = arith.negf %93 : vector<8x32xf32>
    %95 = math.exp %94 : vector<8x32xf32>
    %cst_30 = arith.constant 1.000000e+00 : f32
    %96 = vector.broadcast %cst_30 : f32 to vector<8x32xf32>
    %97 = arith.addf %96, %95 : vector<8x32xf32>
    %98 = arith.divf %96, %97 : vector<8x32xf32>
    %99 = vector.extract_strided_slice %80 {offsets = [0, 64], sizes = [8, 32], strides = [1, 1]} : vector<8x96xf32> to vector<8x32xf32>
    %100 = vector.extract_strided_slice %82 {offsets = [0, 64], sizes = [8, 32], strides = [1, 1]} : vector<8x96xf32> to vector<8x32xf32>
    %101 = vector.broadcast %3 : vector<1x32xf32> to vector<8x32xf32>
    %102 = arith.addf %100, %101 : vector<8x32xf32>
    %103 = arith.mulf %90, %102 : vector<8x32xf32>
    %104 = arith.addf %99, %103 : vector<8x32xf32>
    %105 = math.tanh %104 : vector<8x32xf32>
    %cst_31 = arith.constant 1.000000e+00 : f32
    %106 = vector.broadcast %cst_31 : f32 to vector<8x32xf32>
    %107 = arith.subf %106, %98 : vector<8x32xf32>
    %108 = arith.mulf %107, %105 : vector<8x32xf32>
    %109 = arith.mulf %98, %79 : vector<8x32xf32>
    %110 = arith.addf %108, %109 : vector<8x32xf32>
    %111 = vector.extract_strided_slice %16 {offsets = [24, 0], sizes = [8, 96], strides = [1, 1]} : vector<64x96xf32> to vector<8x96xf32>
    %112 = arith.truncf %110 : vector<8x32xf32> to vector<8x32xbf16>
    %cst_32 = arith.constant dense<0.000000e+00> : vector<8x96xf32>
    %113 = tpu.matmul %112, %12, %cst_32 {dimension_numbers = #tpu.dot_dimension_numbers<[1], [0], [0], [1], [0, 0, 1, 1], [], []>} : vector<8x32xbf16>, vector<32x96xbf16>, vector<8x96xf32> -> vector<8x96xf32>
    %114 = vector.extract_strided_slice %111 {offsets = [0, 0], sizes = [8, 32], strides = [1, 1]} : vector<8x96xf32> to vector<8x32xf32>
    %115 = vector.extract_strided_slice %113 {offsets = [0, 0], sizes = [8, 32], strides = [1, 1]} : vector<8x96xf32> to vector<8x32xf32>
    %116 = arith.addf %114, %115 : vector<8x32xf32>
    %117 = arith.negf %116 : vector<8x32xf32>
    %118 = math.exp %117 : vector<8x32xf32>
    %cst_33 = arith.constant 1.000000e+00 : f32
    %119 = vector.broadcast %cst_33 : f32 to vector<8x32xf32>
    %120 = arith.addf %119, %118 : vector<8x32xf32>
    %121 = arith.divf %119, %120 : vector<8x32xf32>
    %122 = vector.extract_strided_slice %111 {offsets = [0, 32], sizes = [8, 32], strides = [1, 1]} : vector<8x96xf32> to vector<8x32xf32>
    %123 = vector.extract_strided_slice %113 {offsets = [0, 32], sizes = [8, 32], strides = [1, 1]} : vector<8x96xf32> to vector<8x32xf32>
    %124 = arith.addf %122, %123 : vector<8x32xf32>
    %125 = arith.negf %124 : vector<8x32xf32>
    %126 = math.exp %125 : vector<8x32xf32>
    %cst_34 = arith.constant 1.000000e+00 : f32
    %127 = vector.broadcast %cst_34 : f32 to vector<8x32xf32>
    %128 = arith.addf %127, %126 : vector<8x32xf32>
    %129 = arith.divf %127, %128 : vector<8x32xf32>
    %130 = vector.extract_strided_slice %111 {offsets = [0, 64], sizes = [8, 32], strides = [1, 1]} : vector<8x96xf32> to vector<8x32xf32>
    %131 = vector.extract_strided_slice %113 {offsets = [0, 64], sizes = [8, 32], strides = [1, 1]} : vector<8x96xf32> to vector<8x32xf32>
    %132 = vector.broadcast %3 : vector<1x32xf32> to vector<8x32xf32>
    %133 = arith.addf %131, %132 : vector<8x32xf32>
    %134 = arith.mulf %121, %133 : vector<8x32xf32>
    %135 = arith.addf %130, %134 : vector<8x32xf32>
    %136 = math.tanh %135 : vector<8x32xf32>
    %cst_35 = arith.constant 1.000000e+00 : f32
    %137 = vector.broadcast %cst_35 : f32 to vector<8x32xf32>
    %138 = arith.subf %137, %129 : vector<8x32xf32>
    %139 = arith.mulf %138, %136 : vector<8x32xf32>
    %140 = arith.mulf %129, %110 : vector<8x32xf32>
    %141 = arith.addf %139, %140 : vector<8x32xf32>
    %142 = vector.extract_strided_slice %16 {offsets = [32, 0], sizes = [8, 96], strides = [1, 1]} : vector<64x96xf32> to vector<8x96xf32>
    %143 = arith.truncf %141 : vector<8x32xf32> to vector<8x32xbf16>
    %cst_36 = arith.constant dense<0.000000e+00> : vector<8x96xf32>
    %144 = tpu.matmul %143, %12, %cst_36 {dimension_numbers = #tpu.dot_dimension_numbers<[1], [0], [0], [1], [0, 0, 1, 1], [], []>} : vector<8x32xbf16>, vector<32x96xbf16>, vector<8x96xf32> -> vector<8x96xf32>
    %145 = vector.extract_strided_slice %142 {offsets = [0, 0], sizes = [8, 32], strides = [1, 1]} : vector<8x96xf32> to vector<8x32xf32>
    %146 = vector.extract_strided_slice %144 {offsets = [0, 0], sizes = [8, 32], strides = [1, 1]} : vector<8x96xf32> to vector<8x32xf32>
    %147 = arith.addf %145, %146 : vector<8x32xf32>
    %148 = arith.negf %147 : vector<8x32xf32>
    %149 = math.exp %148 : vector<8x32xf32>
    %cst_37 = arith.constant 1.000000e+00 : f32
    %150 = vector.broadcast %cst_37 : f32 to vector<8x32xf32>
    %151 = arith.addf %150, %149 : vector<8x32xf32>
    %152 = arith.divf %150, %151 : vector<8x32xf32>
    %153 = vector.extract_strided_slice %142 {offsets = [0, 32], sizes = [8, 32], strides = [1, 1]} : vector<8x96xf32> to vector<8x32xf32>
    %154 = vector.extract_strided_slice %144 {offsets = [0, 32], sizes = [8, 32], strides = [1, 1]} : vector<8x96xf32> to vector<8x32xf32>
    %155 = arith.addf %153, %154 : vector<8x32xf32>
    %156 = arith.negf %155 : vector<8x32xf32>
    %157 = math.exp %156 : vector<8x32xf32>
    %cst_38 = arith.constant 1.000000e+00 : f32
    %158 = vector.broadcast %cst_38 : f32 to vector<8x32xf32>
    %159 = arith.addf %158, %157 : vector<8x32xf32>
    %160 = arith.divf %158, %159 : vector<8x32xf32>
    %161 = vector.extract_strided_slice %142 {offsets = [0, 64], sizes = [8, 32], strides = [1, 1]} : vector<8x96xf32> to vector<8x32xf32>
    %162 = vector.extract_strided_slice %144 {offsets = [0, 64], sizes = [8, 32], strides = [1, 1]} : vector<8x96xf32> to vector<8x32xf32>
    %163 = vector.broadcast %3 : vector<1x32xf32> to vector<8x32xf32>
    %164 = arith.addf %162, %163 : vector<8x32xf32>
    %165 = arith.mulf %152, %164 : vector<8x32xf32>
    %166 = arith.addf %161, %165 : vector<8x32xf32>
    %167 = math.tanh %166 : vector<8x32xf32>
    %cst_39 = arith.constant 1.000000e+00 : f32
    %168 = vector.broadcast %cst_39 : f32 to vector<8x32xf32>
    %169 = arith.subf %168, %160 : vector<8x32xf32>
    %170 = arith.mulf %169, %167 : vector<8x32xf32>
    %171 = arith.mulf %160, %141 : vector<8x32xf32>
    %172 = arith.addf %170, %171 : vector<8x32xf32>
    %173 = vector.extract_strided_slice %16 {offsets = [40, 0], sizes = [8, 96], strides = [1, 1]} : vector<64x96xf32> to vector<8x96xf32>
    %174 = arith.truncf %172 : vector<8x32xf32> to vector<8x32xbf16>
    %cst_40 = arith.constant dense<0.000000e+00> : vector<8x96xf32>
    %175 = tpu.matmul %174, %12, %cst_40 {dimension_numbers = #tpu.dot_dimension_numbers<[1], [0], [0], [1], [0, 0, 1, 1], [], []>} : vector<8x32xbf16>, vector<32x96xbf16>, vector<8x96xf32> -> vector<8x96xf32>
    %176 = vector.extract_strided_slice %173 {offsets = [0, 0], sizes = [8, 32], strides = [1, 1]} : vector<8x96xf32> to vector<8x32xf32>
    %177 = vector.extract_strided_slice %175 {offsets = [0, 0], sizes = [8, 32], strides = [1, 1]} : vector<8x96xf32> to vector<8x32xf32>
    %178 = arith.addf %176, %177 : vector<8x32xf32>
    %179 = arith.negf %178 : vector<8x32xf32>
    %180 = math.exp %179 : vector<8x32xf32>
    %cst_41 = arith.constant 1.000000e+00 : f32
    %181 = vector.broadcast %cst_41 : f32 to vector<8x32xf32>
    %182 = arith.addf %181, %180 : vector<8x32xf32>
    %183 = arith.divf %181, %182 : vector<8x32xf32>
    %184 = vector.extract_strided_slice %173 {offsets = [0, 32], sizes = [8, 32], strides = [1, 1]} : vector<8x96xf32> to vector<8x32xf32>
    %185 = vector.extract_strided_slice %175 {offsets = [0, 32], sizes = [8, 32], strides = [1, 1]} : vector<8x96xf32> to vector<8x32xf32>
    %186 = arith.addf %184, %185 : vector<8x32xf32>
    %187 = arith.negf %186 : vector<8x32xf32>
    %188 = math.exp %187 : vector<8x32xf32>
    %cst_42 = arith.constant 1.000000e+00 : f32
    %189 = vector.broadcast %cst_42 : f32 to vector<8x32xf32>
    %190 = arith.addf %189, %188 : vector<8x32xf32>
    %191 = arith.divf %189, %190 : vector<8x32xf32>
    %192 = vector.extract_strided_slice %173 {offsets = [0, 64], sizes = [8, 32], strides = [1, 1]} : vector<8x96xf32> to vector<8x32xf32>
    %193 = vector.extract_strided_slice %175 {offsets = [0, 64], sizes = [8, 32], strides = [1, 1]} : vector<8x96xf32> to vector<8x32xf32>
    %194 = vector.broadcast %3 : vector<1x32xf32> to vector<8x32xf32>
    %195 = arith.addf %193, %194 : vector<8x32xf32>
    %196 = arith.mulf %183, %195 : vector<8x32xf32>
    %197 = arith.addf %192, %196 : vector<8x32xf32>
    %198 = math.tanh %197 : vector<8x32xf32>
    %cst_43 = arith.constant 1.000000e+00 : f32
    %199 = vector.broadcast %cst_43 : f32 to vector<8x32xf32>
    %200 = arith.subf %199, %191 : vector<8x32xf32>
    %201 = arith.mulf %200, %198 : vector<8x32xf32>
    %202 = arith.mulf %191, %172 : vector<8x32xf32>
    %203 = arith.addf %201, %202 : vector<8x32xf32>
    %204 = vector.extract_strided_slice %16 {offsets = [48, 0], sizes = [8, 96], strides = [1, 1]} : vector<64x96xf32> to vector<8x96xf32>
    %205 = arith.truncf %203 : vector<8x32xf32> to vector<8x32xbf16>
    %cst_44 = arith.constant dense<0.000000e+00> : vector<8x96xf32>
    %206 = tpu.matmul %205, %12, %cst_44 {dimension_numbers = #tpu.dot_dimension_numbers<[1], [0], [0], [1], [0, 0, 1, 1], [], []>} : vector<8x32xbf16>, vector<32x96xbf16>, vector<8x96xf32> -> vector<8x96xf32>
    %207 = vector.extract_strided_slice %204 {offsets = [0, 0], sizes = [8, 32], strides = [1, 1]} : vector<8x96xf32> to vector<8x32xf32>
    %208 = vector.extract_strided_slice %206 {offsets = [0, 0], sizes = [8, 32], strides = [1, 1]} : vector<8x96xf32> to vector<8x32xf32>
    %209 = arith.addf %207, %208 : vector<8x32xf32>
    %210 = arith.negf %209 : vector<8x32xf32>
    %211 = math.exp %210 : vector<8x32xf32>
    %cst_45 = arith.constant 1.000000e+00 : f32
    %212 = vector.broadcast %cst_45 : f32 to vector<8x32xf32>
    %213 = arith.addf %212, %211 : vector<8x32xf32>
    %214 = arith.divf %212, %213 : vector<8x32xf32>
    %215 = vector.extract_strided_slice %204 {offsets = [0, 32], sizes = [8, 32], strides = [1, 1]} : vector<8x96xf32> to vector<8x32xf32>
    %216 = vector.extract_strided_slice %206 {offsets = [0, 32], sizes = [8, 32], strides = [1, 1]} : vector<8x96xf32> to vector<8x32xf32>
    %217 = arith.addf %215, %216 : vector<8x32xf32>
    %218 = arith.negf %217 : vector<8x32xf32>
    %219 = math.exp %218 : vector<8x32xf32>
    %cst_46 = arith.constant 1.000000e+00 : f32
    %220 = vector.broadcast %cst_46 : f32 to vector<8x32xf32>
    %221 = arith.addf %220, %219 : vector<8x32xf32>
    %222 = arith.divf %220, %221 : vector<8x32xf32>
    %223 = vector.extract_strided_slice %204 {offsets = [0, 64], sizes = [8, 32], strides = [1, 1]} : vector<8x96xf32> to vector<8x32xf32>
    %224 = vector.extract_strided_slice %206 {offsets = [0, 64], sizes = [8, 32], strides = [1, 1]} : vector<8x96xf32> to vector<8x32xf32>
    %225 = vector.broadcast %3 : vector<1x32xf32> to vector<8x32xf32>
    %226 = arith.addf %224, %225 : vector<8x32xf32>
    %227 = arith.mulf %214, %226 : vector<8x32xf32>
    %228 = arith.addf %223, %227 : vector<8x32xf32>
    %229 = math.tanh %228 : vector<8x32xf32>
    %cst_47 = arith.constant 1.000000e+00 : f32
    %230 = vector.broadcast %cst_47 : f32 to vector<8x32xf32>
    %231 = arith.subf %230, %222 : vector<8x32xf32>
    %232 = arith.mulf %231, %229 : vector<8x32xf32>
    %233 = arith.mulf %222, %203 : vector<8x32xf32>
    %234 = arith.addf %232, %233 : vector<8x32xf32>
    %235 = vector.extract_strided_slice %16 {offsets = [56, 0], sizes = [8, 96], strides = [1, 1]} : vector<64x96xf32> to vector<8x96xf32>
    %236 = arith.truncf %234 : vector<8x32xf32> to vector<8x32xbf16>
    %cst_48 = arith.constant dense<0.000000e+00> : vector<8x96xf32>
    %237 = tpu.matmul %236, %12, %cst_48 {dimension_numbers = #tpu.dot_dimension_numbers<[1], [0], [0], [1], [0, 0, 1, 1], [], []>} : vector<8x32xbf16>, vector<32x96xbf16>, vector<8x96xf32> -> vector<8x96xf32>
    %238 = vector.extract_strided_slice %235 {offsets = [0, 0], sizes = [8, 32], strides = [1, 1]} : vector<8x96xf32> to vector<8x32xf32>
    %239 = vector.extract_strided_slice %237 {offsets = [0, 0], sizes = [8, 32], strides = [1, 1]} : vector<8x96xf32> to vector<8x32xf32>
    %240 = arith.addf %238, %239 : vector<8x32xf32>
    %241 = arith.negf %240 : vector<8x32xf32>
    %242 = math.exp %241 : vector<8x32xf32>
    %cst_49 = arith.constant 1.000000e+00 : f32
    %243 = vector.broadcast %cst_49 : f32 to vector<8x32xf32>
    %244 = arith.addf %243, %242 : vector<8x32xf32>
    %245 = arith.divf %243, %244 : vector<8x32xf32>
    %246 = vector.extract_strided_slice %235 {offsets = [0, 32], sizes = [8, 32], strides = [1, 1]} : vector<8x96xf32> to vector<8x32xf32>
    %247 = vector.extract_strided_slice %237 {offsets = [0, 32], sizes = [8, 32], strides = [1, 1]} : vector<8x96xf32> to vector<8x32xf32>
    %248 = arith.addf %246, %247 : vector<8x32xf32>
    %249 = arith.negf %248 : vector<8x32xf32>
    %250 = math.exp %249 : vector<8x32xf32>
    %cst_50 = arith.constant 1.000000e+00 : f32
    %251 = vector.broadcast %cst_50 : f32 to vector<8x32xf32>
    %252 = arith.addf %251, %250 : vector<8x32xf32>
    %253 = arith.divf %251, %252 : vector<8x32xf32>
    %254 = vector.extract_strided_slice %235 {offsets = [0, 64], sizes = [8, 32], strides = [1, 1]} : vector<8x96xf32> to vector<8x32xf32>
    %255 = vector.extract_strided_slice %237 {offsets = [0, 64], sizes = [8, 32], strides = [1, 1]} : vector<8x96xf32> to vector<8x32xf32>
    %256 = vector.broadcast %3 : vector<1x32xf32> to vector<8x32xf32>
    %257 = arith.addf %255, %256 : vector<8x32xf32>
    %258 = arith.mulf %245, %257 : vector<8x32xf32>
    %259 = arith.addf %254, %258 : vector<8x32xf32>
    %260 = math.tanh %259 : vector<8x32xf32>
    %cst_51 = arith.constant 1.000000e+00 : f32
    %261 = vector.broadcast %cst_51 : f32 to vector<8x32xf32>
    %262 = arith.subf %261, %253 : vector<8x32xf32>
    %263 = arith.mulf %262, %260 : vector<8x32xf32>
    %264 = arith.mulf %253, %234 : vector<8x32xf32>
    %265 = arith.addf %263, %264 : vector<8x32xf32>
    %266 = vector.extract_strided_slice %265 {offsets = [0, 0], sizes = [2, 32], strides = [1, 1]} : vector<8x32xf32> to vector<2x32xf32>
    %267 = arith.truncf %266 : vector<2x32xf32> to vector<2x32xbf16>
    %c48 = arith.constant 48 : index
    %c0_52 = arith.constant 0 : index
    %268 = vector.load %arg3[%c48, %c0_52] : memref<224x128xbf16, #tpu.memory_space<vmem>>, vector<16x32xbf16>
    %c64 = arith.constant 64 : index
    %c0_53 = arith.constant 0 : index
    %269 = vector.load %arg3[%c64, %c0_53] : memref<224x128xbf16, #tpu.memory_space<vmem>>, vector<32x32xbf16>
    %c192 = arith.constant 192 : index
    %c0_54 = arith.constant 0 : index
    %270 = vector.load %arg3[%c192, %c0_54] : memref<224x128xbf16, #tpu.memory_space<vmem>>, vector<32x1xbf16>
    %271 = vector.shape_cast %0 : vector<2x8x16xf32> to vector<16x16xf32>
    %272 = arith.truncf %271 : vector<16x16xf32> to vector<16x16xbf16>
    %cst_55 = arith.constant dense<0.000000e+00> : vector<16x32xf32>
    %273 = tpu.matmul %272, %268, %cst_55 {dimension_numbers = #tpu.dot_dimension_numbers<[1], [0], [0], [1], [0, 0, 1, 1], [], []>} : vector<16x16xbf16>, vector<16x32xbf16>, vector<16x32xf32> -> vector<16x32xf32>
    %274 = vector.broadcast %4 : vector<1x32xf32> to vector<16x32xf32>
    %275 = arith.addf %273, %274 : vector<16x32xf32>
    %cst_56 = arith.constant 0.000000e+00 : f32
    %276 = vector.broadcast %cst_56 : f32 to vector<16x32xf32>
    %277 = arith.maximumf %275, %276 : vector<16x32xf32>
    %cst_57 = arith.constant dense<0.000000e+00> : vector<2x32xf32>
    %278 = tpu.matmul %267, %269, %cst_57 {dimension_numbers = #tpu.dot_dimension_numbers<[1], [0], [0], [1], [0, 0, 1, 1], [], []>} : vector<2x32xbf16>, vector<32x32xbf16>, vector<2x32xf32> -> vector<2x32xf32>
    %279 = vector.broadcast %5 : vector<1x32xf32> to vector<2x32xf32>
    %280 = arith.addf %278, %279 : vector<2x32xf32>
    %cst_58 = arith.constant 0.000000e+00 : f32
    %281 = vector.broadcast %cst_58 : f32 to vector<2x32xf32>
    %282 = arith.maximumf %280, %281 : vector<2x32xf32>
    %283 = vector.shape_cast %277 : vector<16x32xf32> to vector<2x8x32xf32>
    %284 = vector.shape_cast %282 : vector<2x32xf32> to vector<2x1x32xf32>
    %285 = vector.broadcast %284 : vector<2x1x32xf32> to vector<2x8x32xf32>
    %286 = arith.mulf %283, %285 : vector<2x8x32xf32>
    %287 = vector.shape_cast %286 : vector<2x8x32xf32> to vector<16x32xf32>
    %288 = arith.truncf %287 : vector<16x32xf32> to vector<16x32xbf16>
    %cst_59 = arith.constant dense<0.000000e+00> : vector<16x1xf32>
    %289 = tpu.matmul %288, %270, %cst_59 {dimension_numbers = #tpu.dot_dimension_numbers<[1], [0], [0], [1], [0, 0, 1, 1], [], []>} : vector<16x32xbf16>, vector<32x1xbf16>, vector<16x1xf32> -> vector<16x1xf32>
    %290 = tpu.iota {dimensions = array<i32: 0>} : vector<16x8xi32>
    %291 = tpu.iota {dimensions = array<i32: 1>} : vector<16x8xi32>
    %c7_i32 = arith.constant 7 : i32
    %292 = vector.broadcast %c7_i32 : i32 to vector<16x8xi32>
    %293 = arith.andi %290, %292 : vector<16x8xi32>
    %294 = arith.cmpi eq, %293, %291 : vector<16x8xi32>
    %295 = arith.extui %294 : vector<16x8xi1> to vector<16x8xi32>
    %296 = arith.sitofp %295 : vector<16x8xi32> to vector<16x8xf32>
    %297 = vector.broadcast %289 : vector<16x1xf32> to vector<16x8xf32>
    %298 = arith.mulf %297, %296 : vector<16x8xf32>
    %299 = vector.shape_cast %298 : vector<16x8xf32> to vector<2x8x8xf32>
    %cst_60 = arith.constant dense<0.000000e+00> : vector<2x8xf32>
    %300 = vector.multi_reduction <add>, %299, %cst_60 [1] : vector<2x8x8xf32> to vector<2x8xf32>
    %301 = vector.broadcast %6 : vector<1x1xf32> to vector<2x8xf32>
    %302 = arith.addf %300, %301 : vector<2x8xf32>
    %303 = vector.shape_cast %302 : vector<2x8xf32> to vector<1x2x8xf32>
    %cst_61 = arith.constant dense<0xFF800000> : vector<1xf32>
    %304 = vector.multi_reduction <maximumf>, %303, %cst_61 [1, 2] : vector<1x2x8xf32> to vector<1xf32>
    %305 = vector.shape_cast %304 : vector<1xf32> to vector<1x1x1xf32>
    %306 = vector.extract %305[0, 0, 0] : f32 from vector<1x1x1xf32>
    %307 = vector.broadcast %306 : f32 to vector<2x8xf32>
    %308 = arith.subf %302, %307 : vector<2x8xf32>
    %309 = math.exp %308 : vector<2x8xf32>
    %310 = arith.mulf %309, %1 : vector<2x8xf32>
    %cst_62 = arith.constant dense<0.000000e+00> : vector<2xf32>
    %311 = vector.multi_reduction <add>, %310, %cst_62 [1] : vector<2x8xf32> to vector<2xf32>
    %312 = vector.shape_cast %311 : vector<2xf32> to vector<2x1xf32>
    %cst_63 = arith.constant 9.99999974E-6 : f32
    %313 = vector.broadcast %cst_63 : f32 to vector<2x1xf32>
    %314 = arith.addf %312, %313 : vector<2x1xf32>
    %315 = tpu.reciprocal %314 {approx = true} : vector<2x1xf32> -> vector<2x1xf32>
    %316 = vector.broadcast %315 : vector<2x1xf32> to vector<2x8xf32>
    %317 = arith.mulf %310, %316 : vector<2x8xf32>
    %318 = vector.shape_cast %317 : vector<2x8xf32> to vector<2x1x8xf32>
    "tpu.trace_start"() <{level = 10 : i32, message = "bxk,bkd->bxd"}> : () -> ()
    %cst_64 = arith.constant dense<0.000000e+00> : vector<2x1x16xf32>
    %319 = tpu.matmul %318, %0, %cst_64 {dimension_numbers = #tpu.dot_dimension_numbers<[2], [1], [1], [2], [0, 0, 0, 1, 1, 2], [0], [0]>} : vector<2x1x8xf32>, vector<2x8x16xf32>, vector<2x1x16xf32> -> vector<2x1x16xf32>
    "tpu.trace_stop"() : () -> ()
    %cst_65 = arith.constant dense<0.000000e+00> : vector<2x16xf32>
    %320 = vector.multi_reduction <add>, %319, %cst_65 [1] : vector<2x1x16xf32> to vector<2x16xf32>
    %c96 = arith.constant 96 : index
    %c0_66 = arith.constant 0 : index
    %321 = vector.load %arg3[%c96, %c0_66] : memref<224x128xbf16, #tpu.memory_space<vmem>>, vector<32x32xbf16>
    %c128 = arith.constant 128 : index
    %c0_67 = arith.constant 0 : index
    %322 = vector.load %arg3[%c128, %c0_67] : memref<224x128xbf16, #tpu.memory_space<vmem>>, vector<16x32xbf16>
    %cst_68 = arith.constant dense<0.000000e+00> : vector<2x32xf32>
    %323 = tpu.matmul %267, %321, %cst_68 {dimension_numbers = #tpu.dot_dimension_numbers<[1], [0], [0], [1], [0, 0, 1, 1], [], []>} : vector<2x32xbf16>, vector<32x32xbf16>, vector<2x32xf32> -> vector<2x32xf32>
    %324 = vector.broadcast %7 : vector<1x32xf32> to vector<2x32xf32>
    %325 = arith.addf %323, %324 : vector<2x32xf32>
    %cst_69 = arith.constant 0.000000e+00 : f32
    %326 = vector.broadcast %cst_69 : f32 to vector<2x32xf32>
    %327 = arith.maximumf %325, %326 : vector<2x32xf32>
    %328 = arith.truncf %320 : vector<2x16xf32> to vector<2x16xbf16>
    %cst_70 = arith.constant dense<0.000000e+00> : vector<2x32xf32>
    %329 = tpu.matmul %328, %322, %cst_70 {dimension_numbers = #tpu.dot_dimension_numbers<[1], [0], [0], [1], [0, 0, 1, 1], [], []>} : vector<2x16xbf16>, vector<16x32xbf16>, vector<2x32xf32> -> vector<2x32xf32>
    %330 = vector.broadcast %8 : vector<1x32xf32> to vector<2x32xf32>
    %331 = arith.addf %329, %330 : vector<2x32xf32>
    %cst_71 = arith.constant 0.000000e+00 : f32
    %332 = vector.broadcast %cst_71 : f32 to vector<2x32xf32>
    %333 = arith.maximumf %331, %332 : vector<2x32xf32>
    %334 = arith.mulf %327, %333 : vector<2x32xf32>
    %c144 = arith.constant 144 : index
    %c0_72 = arith.constant 0 : index
    %335 = vector.load %arg3[%c144, %c0_72] : memref<224x128xbf16, #tpu.memory_space<vmem>>, vector<32x32xbf16>
    %336 = tpu.concatenate %334, %266 in 0 : vector<2x32xf32>, vector<2x32xf32> -> vector<4x32xf32>
    %337 = arith.truncf %336 : vector<4x32xf32> to vector<4x32xbf16>
    %cst_73 = arith.constant dense<0.000000e+00> : vector<4x32xf32>
    %338 = tpu.matmul %337, %335, %cst_73 {dimension_numbers = #tpu.dot_dimension_numbers<[1], [0], [0], [1], [0, 0, 1, 1], [], []>} : vector<4x32xbf16>, vector<32x32xbf16>, vector<4x32xf32> -> vector<4x32xf32>
    %339 = vector.broadcast %9 : vector<1x32xf32> to vector<4x32xf32>
    %340 = arith.addf %338, %339 : vector<4x32xf32>
    %341 = vector.extract_strided_slice %340 {offsets = [0, 0], sizes = [2, 16], strides = [1, 1]} : vector<4x32xf32> to vector<2x16xf32>
    %342 = vector.extract_strided_slice %340 {offsets = [2, 16], sizes = [2, 16], strides = [1, 1]} : vector<4x32xf32> to vector<2x16xf32>
    %c4_74 = arith.constant 4 : index
    %c0_75 = arith.constant 0 : index
    %343 = vector.load %arg2[%c4_74, %c0_75] : memref<8x128xf32, #tpu.memory_space<vmem>>, vector<2x16xf32>
    %c176 = arith.constant 176 : index
    %c0_76 = arith.constant 0 : index
    %344 = vector.load %arg3[%c176, %c0_76] : memref<224x128xbf16, #tpu.memory_space<vmem>>, vector<16x16xbf16>
    %345 = arith.truncf %342 : vector<2x16xf32> to vector<2x16xbf16>
    %cst_77 = arith.constant dense<0.000000e+00> : vector<2x16xf32>
    %346 = tpu.matmul %345, %344, %cst_77 {dimension_numbers = #tpu.dot_dimension_numbers<[1], [0], [0], [1], [0, 0, 1, 1], [], []>} : vector<2x16xbf16>, vector<16x16xbf16>, vector<2x16xf32> -> vector<2x16xf32>
    %347 = vector.broadcast %10 : vector<1x16xf32> to vector<2x16xf32>
    %348 = arith.addf %346, %347 : vector<2x16xf32>
    %349 = arith.negf %342 : vector<2x16xf32>
    %350 = math.exp %349 : vector<2x16xf32>
    %cst_78 = arith.constant 1.000000e+00 : f32
    %351 = vector.broadcast %cst_78 : f32 to vector<2x16xf32>
    %352 = arith.addf %351, %350 : vector<2x16xf32>
    %353 = arith.divf %351, %352 : vector<2x16xf32>
    %354 = arith.mulf %341, %353 : vector<2x16xf32>
    %cst_79 = arith.constant 0.000000e+00 : f32
    %355 = vector.broadcast %cst_79 : f32 to vector<2x16xf32>
    %356 = arith.maximumf %354, %355 : vector<2x16xf32>
    %357 = arith.mulf %354, %343 : vector<2x16xf32>
    %358 = arith.subf %356, %357 : vector<2x16xf32>
    %359 = math.absf %354 : vector<2x16xf32>
    %cst_80 = arith.constant 0.000000e+00 : f32
    %360 = vector.broadcast %cst_80 : f32 to vector<2x16xf32>
    %361 = arith.subf %360, %359 : vector<2x16xf32>
    %362 = math.exp %361 : vector<2x16xf32>
    %cst_81 = arith.constant 1.000000e+00 : f32
    %363 = vector.broadcast %cst_81 : f32 to vector<2x16xf32>
    %364 = arith.addf %363, %362 : vector<2x16xf32>
    %365 = math.log %364 : vector<2x16xf32>
    %366 = arith.addf %358, %365 : vector<2x16xf32>
    %367 = vector.shape_cast %366 : vector<2x16xf32> to vector<1x2x16xf32>
    %cst_82 = arith.constant dense<0.000000e+00> : vector<1xf32>
    %368 = vector.multi_reduction <add>, %367, %cst_82 [1, 2] : vector<1x2x16xf32> to vector<1xf32>
    %369 = vector.shape_cast %368 : vector<1xf32> to vector<1x1x1xf32>
    %370 = vector.extract %369[0, 0, 0] : f32 from vector<1x1x1xf32>
    %cst_83 = arith.constant 3.200000e+01 : f32
    %371 = arith.divf %370, %cst_83 : f32
    %cst_84 = arith.constant 0.000000e+00 : f32
    %372 = vector.broadcast %cst_84 : f32 to vector<2x16xf32>
    %373 = arith.maximumf %348, %372 : vector<2x16xf32>
    %374 = arith.mulf %348, %343 : vector<2x16xf32>
    %375 = arith.subf %373, %374 : vector<2x16xf32>
    %376 = math.absf %348 : vector<2x16xf32>
    %cst_85 = arith.constant 0.000000e+00 : f32
    %377 = vector.broadcast %cst_85 : f32 to vector<2x16xf32>
    %378 = arith.subf %377, %376 : vector<2x16xf32>
    %379 = math.exp %378 : vector<2x16xf32>
    %cst_86 = arith.constant 1.000000e+00 : f32
    %380 = vector.broadcast %cst_86 : f32 to vector<2x16xf32>
    %381 = arith.addf %380, %379 : vector<2x16xf32>
    %382 = math.log %381 : vector<2x16xf32>
    %383 = arith.addf %375, %382 : vector<2x16xf32>
    %384 = vector.shape_cast %383 : vector<2x16xf32> to vector<1x2x16xf32>
    %cst_87 = arith.constant dense<0.000000e+00> : vector<1xf32>
    %385 = vector.multi_reduction <add>, %384, %cst_87 [1, 2] : vector<1x2x16xf32> to vector<1xf32>
    %386 = vector.shape_cast %385 : vector<1xf32> to vector<1x1x1xf32>
    %387 = vector.extract %386[0, 0, 0] : f32 from vector<1x1x1xf32>
    %cst_88 = arith.constant 3.200000e+01 : f32
    %388 = arith.divf %387, %cst_88 : f32
    %389 = arith.addf %371, %388 : f32
    %cst_89 = arith.constant 1.600000e+01 : f32
    %390 = arith.mulf %389, %cst_89 : f32
    %391 = tpu.iota {dimensions = array<i32: 1>} : vector<1x128xi32>
    %c0_i32 = arith.constant 0 : i32
    %392 = vector.broadcast %c0_i32 : i32 to vector<1x128xi32>
    %393 = arith.cmpi eq, %391, %392 : vector<1x128xi32>
    %394 = arith.extui %393 : vector<1x128xi1> to vector<1x128xi32>
    %395 = arith.sitofp %394 : vector<1x128xi32> to vector<1x128xf32>
    %396 = vector.broadcast %390 : f32 to vector<1x128xf32>
    %397 = arith.mulf %396, %395 : vector<1x128xf32>
    %cst_90 = arith.constant 0.000000e+00 : f32
    %398 = vector.broadcast %cst_90 : f32 to vector<2x112xf32>
    %399 = tpu.concatenate %341, %398 in 1 : vector<2x16xf32>, vector<2x112xf32> -> vector<2x128xf32>
    %cst_91 = arith.constant 0.000000e+00 : f32
    %400 = vector.broadcast %cst_91 : f32 to vector<2x120xf32>
    %401 = tpu.concatenate %317, %400 in 1 : vector<2x8xf32>, vector<2x120xf32> -> vector<2x128xf32>
    %cst_92 = arith.constant 0.000000e+00 : f32
    %402 = vector.broadcast %cst_92 : f32 to vector<3x128xf32>
    %403 = tpu.concatenate %399, %401, %397, %402 in 0 : vector<2x128xf32>, vector<2x128xf32>, vector<1x128xf32>, vector<3x128xf32> -> vector<8x128xf32>
    %c0_93 = arith.constant 0 : index
    %c0_94 = arith.constant 0 : index
    %404 = vector.load %arg5[%c0_93, %c0_94] : memref<8x128xf32, #tpu.memory_space<vmem>>, vector<8x128xf32>
    tpu.vector_store %arg5[%c0_93, %c0_94], %403 {strides = array<i32>} : memref<8x128xf32, #tpu.memory_space<vmem>>, vector<8x128xf32>,
    return
  }
}

</mosaic_0001>

<bundles_post_ra>
// kernel: _rubi_forward.1
= control target key start
LH: loop header
LB: loop body
LE: loop exit
PB: predicated region body
PF: predicated region fallthrough
CT: control target
= control target key end

     0   :  { %v1907_v0 = vmov 0.0   ;;  %vm1908_vm0 = vmmov 0   ;;  %vm77_vm1 = vcmask 130048   ;;  %v1909_v3 = vmov 0   ;;  %s1910_s30 = smov 64   ;;  %s1911_s8 = smov 96   ;;  %s2255_s3 = inlined_call_operand.vmem [shape: bf16[224,128], index: 3, kind: input, shape index: {}]   ;;  %s2256_s0 = inlined_call_operand.vmem [shape: bf16[64,16], index: 0, kind: input, shape index: {}]   ;;  %s2257_s4 = inlined_call_operand.vmem [shape: f32[16,128], index: 4, kind: input, shape index: {}]   ;;  %s2258_s1 = inlined_call_operand.vmem [shape: f32[2,8,16], index: 1, kind: input, shape index: {}]   ;;  %s2259_s2 = inlined_call_operand.vmem [shape: f32[8,128], index: 2, kind: input, shape index: {}]   ;;  %s2260_s5 = inlined_call_operand.vmem [shape: f32[8,128], index: 5, kind: output, shape index: {}]  }
   0x1   :  { %1682 = vmatprep.subr.bf16.mxu1 %v1907_v0  ;;  %v1823_v1 = vld [vmem:[%s2255_s3] sm:$0xff]   ;;  %1686 = vmatprep.mubr.msk.bf16.mxu1 %vm1908_vm0, %v1907_v0  ;;  %v1953_v2 = vld [vmem:[%s2255_s3 + $0x8] sm:$0xff]   ;;  %v1967_v6 = vld [vmem:[%s2255_s3 + $0x10] sm:$0xff]   ;;  %vm167_vm2 = vcmask 261120   ;;  %vm1012_vm5 = vcmask 64512   ;;  %vm1055_vm6 = vcmask 1041409  }
   0x2   :  { %1821 = vset.pattern.permute.xlu1 %v1909_v3  ;;  %1822 = vset.pattern.permute.xlu0 %v1909_v3  ;;  %v1825_v4 = vld [vmem:[%s2256_s0] sm:$0xff]   ;;  %v1826_v5 = vld [vmem:[%s2256_s0 + $0x8] sm:$0xff]   ;;  %v1828_v52 = vld [vmem:[%s2256_s0 + $0x10] sm:$0xff]   ;;  %vm1058_vm7 = vcmask 58368   ;;  %vm1354_vm8 = vcmask 1041408   ;;  %s1913_s26 = smov 112  }
   0x3   :  { %1672 = vmatprep.subr.bf16.mxu0 %v1823_v1  ;;  %1683 = vmatpush3.bf16.msra.mxu1 %v1953_v2  ;;  %v1576_v7 = vld [vmem:[%s2257_s4 + $0x1] ss:$0 sm:$0xff]  ;;  %v1998_v18 = vld [vmem:[%s2257_s4] ss:$0 sm:$0xff]  ;;  %v1829_v53 = vld [vmem:[%s2256_s0 + $0x18] sm:$0xff]   ;;  %vm1500_vm9 = vcmask 123904  }
   0x4   :  { %1673 = vmatpush3.bf16.msra.mxu0 %v1823_v1  ;;  %1674 = vmatprep.mubr.msk.bf16.mxu0 %vm77_vm1, %v1825_v4  ;;  %vm1554_vm11 = vcmask 1043456   ;;  %vm1556_vm12 = vcmask 1044480  }
   0x5   :  { %1684 = vmatprep.subr.bf16.mxu1 %v1907_v0  ;;  %1698 = vmatprep.subr.bf16.mxu0 %v1907_v0 }
   0x6   :  { %223 = vrot.lane.b32.xlu0 %v1576_v7, %s1910_s30 }
   0x7   :  { %1675 = vmatmul.mubr.msk.bf16.vlgmr.msra.gmra.mrb[0].mxu0 %vm77_vm1, %v1826_v5  ;;  %1685 = vmatpush3.bf16.msra.mxu1 %v1967_v6 }
   0x8   :  { %1699 = vmatpush3.bf16.msra.mxu0 %v1953_v2  ;;  %1690 = vmatprep.subr.bf16.mxu1 %v1907_v0 }
   0x9   :  { %1700 = vmatprep.subr.bf16.mxu0 %v1907_v0  ;;  %1678 = vmatprep.mubr.msk.bf16.mxu0 %vm77_vm1, %v1828_v52 }
   0xa   :  { %1687 = vmatmul.mubr.bf16.vlgmr.msra.gmra.mrb[0].mxu1 %v1909_v3 }
   0xb   :  { %1691 = vmatpush3.bf16.msra.mxu1 %v1953_v2  ;;  %1694 = vmatprep.mubr.msk.bf16.mxu1 %vm1908_vm0, %v1907_v0 }
   0xc   :  { %1692 = vmatprep.subr.bf16.mxu1 %v1907_v0  ;;  %1701 = vmatpush3.bf16.msra.mxu0 %v1967_v6 }
   0xd   :  { %1714 = vmatprep.subr.bf16.mxu0 %v1907_v0 }
   0xf   :  { %1693 = vmatpush3.bf16.msra.mxu1 %v1967_v6  ;;  %1679 = vmatmul.mubr.msk.bf16.gmra.mrb[4].mxu0 %vm77_vm1, %v1829_v53 }
  0x10   :  { %1706 = vmatprep.subr.bf16.mxu1 %v1907_v0  ;;  %1702 = vmatprep.mubr.msk.bf16.mxu0 %vm1908_vm0, %v1907_v0 }
  0x78   :  { %v1989_v10 = vpop.permute.xlu0 %223 }
  0xda   :  { %v1987_v8 = vpop.f32.mrb[0].mxu0 }
  0xdb   :  { %v124_v9 = vpop.f32.mrb[1].mxu0 }
  0xdc   :  { %v1991_v11 = vpop.f32.mrb[2].mxu0  ;;  %v125_v19 = vadd.f32 %v1998_v18, %v124_v9 }
  0xdd   :  { %v127_v12 = vpop.f32.mrb[3].mxu0  ;;  %v205_v13 = vpop.f32.mrb[0].mxu1 }
  0xde   :  { %v226_v14 = vadd.f32 %v1989_v10, %v205_v13  ;;  %v1688_v15 = vpop.f32.mrb[1].mxu1  ;;  %v211_v20 = vadd.f32 %v205_v13, %v125_v19  ;;  %v128_v42 = vadd.f32 %v1998_v18, %v127_v12  ;;  %v133_v13 = vadd.f32 %v1987_v8, %v1998_v18 }
  0xdf   :  { %v208_v16 = vpop.f32.mrb[2].mxu1 }
  0xe0   :  { %228 = vrot.lane.b32.xlu0 %v226_v14, %s1910_s30  ;;  %v1689_v17 = vpop.f32.mrb[3].mxu1  ;;  %v1575_v21 = vmul.f32 -1.442695, %v211_v20 }
  0xe2   :  { %1841 = vpow2.f32 %v1575_v21  ;;  %v2027_v61 = vpop.f32.mrb[4].mxu0 }
  0xe3   :  { %v2029_v62 = vpop.f32.mrb[5].mxu0 }
  0xe4   :  { %v2031_v63 = vpop.f32.mrb[6].mxu0 }
  0xe5   :  { %v2033_v1 = vpop.f32.mrb[7].mxu0 }
  0xec   :  { %v1842_v22 = vpop.eup %1841 }
  0xed   :  { %v215_v23 = vadd.f32 1.0, %v1842_v22 }
  0xef   :  { %1843 = vrcp.f32 %v215_v23 }
  0xf9   :  { %v1844_v24 = vpop.eup %1843 }
  0xfa   :  { %v238_v30 = vsub.f32 1.0, %v1844_v24  ;;  %v244_v32 = vmul.f32 0.0, %v1844_v24 }
 0x152   :  { %v229_v25 = vpop.permute.xlu0 %228 }
 0x153   :  { %v231_v26 = vmul.f32 %v1844_v24, %v229_v25 }
 0x155   :  { %233 = vrot.lane.b32.xlu1 %v231_v26, %s1910_s30 }
 0x1c7   :  { %v234_v27 = vpop.permute.xlu1 %233 }
 0x1c8   :  { %v236_v28 = vadd.f32 %v234_v27, %v125_v19 }
 0x1ca   :  { %1845 = vtanh.f32 %v236_v28 }
 0x1d4   :  { %v1846_v29 = vpop.eup %1845 }
 0x1d5   :  { %240 = vrot.lane.b32.xlu1 %v1846_v29, %s1911_s8 }
 0x247   :  { %v241_v31 = vpop.permute.xlu1 %240 }
 0x248   :  { %v243_v33 = vmul.f32 %v241_v31, %v238_v30 }
 0x24a   :  { %v245_v34 = vadd.f32 %v244_v32, %v243_v33 }
 0x24c   :  { %v246_v35 = vpack.c.bf16 %v245_v34, %v245_v34 }
 0x24e   :  { %248 = vrot.lane.b32.xlu0 %v246_v35, %s1911_s8 }
 0x2c0   :  { %v249_v36 = vpop.permute.xlu0 %248 }
 0x2c1   :  { %1695 = vmatmul.mubr.msk.bf16.vlgmr.msra.gmra.mrb[4].mxu1 %vm167_vm2, %v249_v36  ;;  %v136_v36 = vadd.f32 %v1991_v11, %v1998_v18 }
 0x2c2   :  { %1707 = vmatpush3.bf16.msra.mxu1 %v1953_v2  ;;  %1710 = vmatprep.mubr.msk.bf16.mxu1 %vm1908_vm0, %v1907_v0 }
 0x2c3   :  { %1708 = vmatprep.subr.bf16.mxu1 %v1907_v0 }
 0x2c6   :  { %1709 = vmatpush3.bf16.msra.mxu1 %v1967_v6 }
 0x2c7   :  { %1722 = vmatprep.subr.bf16.mxu1 %v1907_v0 }
 0x394   :  { %v287_v37 = vpop.f32.mrb[4].mxu1 }
 0x395   :  { %v300_v38 = vadd.f32 %v287_v37, %v1989_v10  ;;  %v1696_v39 = vpop.f32.mrb[5].mxu1  ;;  %v293_v43 = vadd.f32 %v287_v37, %v128_v42 }
 0x396   :  { %v290_v40 = vpop.f32.mrb[6].mxu1 }
 0x397   :  { %302 = vrot.lane.b32.xlu1 %v300_v38, %s1910_s30  ;;  %v1697_v41 = vpop.f32.mrb[7].mxu1  ;;  %v1578_v44 = vmul.f32 -1.442695, %v293_v43 }
 0x399   :  { %1847 = vpow2.f32 %v1578_v44 }
 0x3a3   :  { %v1848_v45 = vpop.eup %1847 }
 0x3a4   :  { %v297_v46 = vadd.f32 1.0, %v1848_v45 }
 0x3a6   :  { %1849 = vrcp.f32 %v297_v46 }
 0x3b0   :  { %v1850_v47 = vpop.eup %1849 }
 0x3b1   :  { %v312_v55 = vsub.f32 1.0, %v1850_v47  ;;  %v318_v57 = vmul.f32 %v1850_v47, %v245_v34 }
 0x409   :  { %v303_v48 = vpop.permute.xlu1 %302 }
 0x40a   :  { %v305_v49 = vmul.f32 %v1850_v47, %v303_v48 }
 0x40c   :  { %307 = vrot.lane.b32.xlu0 %v305_v49, %s1910_s30 }
 0x47e   :  { %v308_v50 = vpop.permute.xlu0 %307 }
 0x47f   :  { %v310_v51 = vadd.f32 %v308_v50, %v128_v42 }
 0x481   :  { %1851 = vtanh.f32 %v310_v51 }
 0x48b   :  { %v1852_v54 = vpop.eup %1851 }
 0x48c   :  { %314 = vrot.lane.b32.xlu1 %v1852_v54, %s1911_s8 }
 0x4fe   :  { %v315_v56 = vpop.permute.xlu1 %314 }
 0x4ff   :  { %v317_v58 = vmul.f32 %v315_v56, %v312_v55 }
 0x501   :  { %v319_v59 = vadd.f32 %v318_v57, %v317_v58  ;;  %v141_v58 = vadd.f32 %v1998_v18, %v2029_v62 }
 0x503   :  { %v320_v60 = vpack.c.bf16 %v319_v59, %v319_v59 }
 0x505   :  { %322 = vrot.lane.b32.xlu0 %v320_v60, %s1911_s8 }
 0x577   :  { %v323_v3 = vpop.permute.xlu0 %322 }
 0x578   :  { %1703 = vmatmul.mubr.msk.bf16.vlgmr.msra.gmra.mrb[8].mxu0 %vm167_vm2, %v323_v3 }
 0x579   :  { %1715 = vmatpush3.bf16.msra.mxu0 %v1953_v2  ;;  %1718 = vmatprep.mubr.msk.bf16.mxu0 %vm1908_vm0, %v1907_v0 }
 0x57a   :  { %1716 = vmatprep.subr.bf16.mxu0 %v1907_v0 }
 0x57d   :  { %1717 = vmatpush3.bf16.msra.mxu0 %v1967_v6 }
 0x57e   :  { %1730 = vmatprep.subr.bf16.mxu0 %v1907_v0 }
 0x64b   :  { %v361_v4 = vpop.f32.mrb[8].mxu0 }
 0x64c   :  { %v374_v5 = vadd.f32 %v361_v4, %v1989_v10  ;;  %v1704_v7 = vpop.f32.mrb[9].mxu0  ;;  %v367_v14 = vadd.f32 %v361_v4, %v133_v13 }
 0x64d   :  { %v364_v9 = vpop.f32.mrb[10].mxu0 }
 0x64e   :  { %376 = vrot.lane.b32.xlu1 %v374_v5, %s1910_s30  ;;  %v1705_v12 = vpop.f32.mrb[11].mxu0  ;;  %v1580_v15 = vmul.f32 -1.442695, %v367_v14 }
 0x650   :  { %1853 = vpow2.f32 %v1580_v15 }
 0x65a   :  { %v1854_v16 = vpop.eup %1853 }
 0x65b   :  { %v371_v17 = vadd.f32 1.0, %v1854_v16 }
 0x65d   :  { %1855 = vrcp.f32 %v371_v17 }
 0x667   :  { %v1856_v19 = vpop.eup %1855 }
 0x668   :  { %v386_v25 = vsub.f32 1.0, %v1856_v19  ;;  %v392_v8 = vmul.f32 %v1856_v19, %v319_v59 }
 0x6c0   :  { %v377_v20 = vpop.permute.xlu1 %376 }
 0x6c1   :  { %v379_v21 = vmul.f32 %v1856_v19, %v377_v20 }
 0x6c3   :  { %381 = vrot.lane.b32.xlu0 %v379_v21, %s1910_s30 }
 0x735   :  { %v382_v22 = vpop.permute.xlu0 %381 }
 0x736   :  { %v384_v23 = vadd.f32 %v382_v22, %v133_v13 }
 0x738   :  { %1857 = vtanh.f32 %v384_v23 }
 0x742   :  { %v1858_v24 = vpop.eup %1857 }
 0x743   :  { %388 = vrot.lane.b32.xlu1 %v1858_v24, %s1911_s8 }
 0x7b5   :  { %v389_v26 = vpop.permute.xlu1 %388 }
 0x7b6   :  { %v391_v27 = vmul.f32 %v389_v26, %v386_v25 }
 0x7b8   :  { %v393_v28 = vadd.f32 %v392_v8, %v391_v27 }
 0x7ba   :  { %v394_v29 = vpack.c.bf16 %v393_v28, %v393_v28 }
 0x7bc   :  { %396 = vrot.lane.b32.xlu0 %v394_v29, %s1911_s8 }
 0x82e   :  { %v397_v30 = vpop.permute.xlu0 %396 }
 0x82f   :  { %1711 = vmatmul.mubr.msk.bf16.vlgmr.msra.gmra.mrb[8].mxu1 %vm167_vm2, %v397_v30 }
 0x830   :  { %1723 = vmatpush3.bf16.msra.mxu1 %v1953_v2  ;;  %1726 = vmatprep.mubr.msk.bf16.mxu1 %vm1908_vm0, %v1907_v0 }
 0x831   :  { %1724 = vmatprep.subr.bf16.mxu1 %v1907_v0 }
 0x834   :  { %1725 = vmatpush3.bf16.msra.mxu1 %v1967_v6 }
 0x835   :  { %1738 = vmatprep.subr.bf16.mxu1 %v1907_v0 }
 0x902   :  { %v435_v31 = vpop.f32.mrb[8].mxu1 }
 0x903   :  { %v448_v32 = vadd.f32 %v435_v31, %v1989_v10  ;;  %v1712_v33 = vpop.f32.mrb[9].mxu1  ;;  %v441_v37 = vadd.f32 %v435_v31, %v136_v36 }
 0x904   :  { %v438_v34 = vpop.f32.mrb[10].mxu1 }
 0x905   :  { %450 = vrot.lane.b32.xlu1 %v448_v32, %s1910_s30  ;;  %v1713_v35 = vpop.f32.mrb[11].mxu1  ;;  %v1582_v38 = vmul.f32 -1.442695, %v441_v37 }
 0x907   :  { %1859 = vpow2.f32 %v1582_v38 }
 0x911   :  { %v1860_v39 = vpop.eup %1859 }
 0x912   :  { %v445_v40 = vadd.f32 1.0, %v1860_v39 }
 0x914   :  { %1861 = vrcp.f32 %v445_v40 }
 0x91e   :  { %v1862_v41 = vpop.eup %1861 }
 0x91f   :  { %v460_v47 = vsub.f32 1.0, %v1862_v41  ;;  %v466_v11 = vmul.f32 %v1862_v41, %v393_v28 }
 0x977   :  { %v451_v42 = vpop.permute.xlu1 %450 }
 0x978   :  { %v453_v43 = vmul.f32 %v1862_v41, %v451_v42 }
 0x97a   :  { %455 = vrot.lane.b32.xlu0 %v453_v43, %s1910_s30 }
 0x9ec   :  { %v456_v44 = vpop.permute.xlu0 %455 }
 0x9ed   :  { %v458_v45 = vadd.f32 %v456_v44, %v136_v36 }
 0x9ef   :  { %1863 = vtanh.f32 %v458_v45 }
 0x9f9   :  { %v1864_v46 = vpop.eup %1863 }
 0x9fa   :  { %462 = vrot.lane.b32.xlu1 %v1864_v46, %s1911_s8  ;;  %v149_v46 = vadd.f32 %v2027_v61, %v1998_v18 }
 0xa6c   :  { %v463_v48 = vpop.permute.xlu1 %462 }
 0xa6d   :  { %v465_v49 = vmul.f32 %v463_v48, %v460_v47 }
 0xa6f   :  { %v467_v50 = vadd.f32 %v466_v11, %v465_v49 }
 0xa71   :  { %v468_v51 = vpack.c.bf16 %v467_v50, %v467_v50 }
 0xa73   :  { %470 = vrot.lane.b32.xlu0 %v468_v51, %s1911_s8 }
 0xae5   :  { %v471_v52 = vpop.permute.xlu0 %470 }
 0xae6   :  { %1719 = vmatmul.mubr.msk.bf16.vlgmr.msra.gmra.mrb[12].mxu0 %vm167_vm2, %v471_v52 }
 0xae7   :  { %1731 = vmatpush3.bf16.msra.mxu0 %v1953_v2  ;;  %1734 = vmatprep.mubr.msk.bf16.mxu0 %vm1908_vm0, %v1907_v0 }
 0xae8   :  { %1732 = vmatprep.subr.bf16.mxu0 %v1907_v0 }
 0xaeb   :  { %1733 = vmatpush3.bf16.msra.mxu0 %v1967_v6 }
 0xaec   :  { %1746 = vmatprep.subr.bf16.mxu0 %v1907_v0 }
 0xbb9   :  { %v509_v53 = vpop.f32.mrb[12].mxu0 }
 0xbba   :  { %v522_v54 = vadd.f32 %v509_v53, %v1989_v10  ;;  %v1720_v55 = vpop.f32.mrb[13].mxu0  ;;  %v515_v59 = vadd.f32 %v509_v53, %v141_v58 }
 0xbbb   :  { %v512_v56 = vpop.f32.mrb[14].mxu0 }
 0xbbc   :  { %524 = vrot.lane.b32.xlu1 %v522_v54, %s1910_s30  ;;  %v1721_v57 = vpop.f32.mrb[15].mxu0  ;;  %v1584_v60 = vmul.f32 -1.442695, %v515_v59 }
 0xbbe   :  { %1865 = vpow2.f32 %v1584_v60 }
 0xbc8   :  { %v1866_v3 = vpop.eup %1865 }
 0xbc9   :  { %v519_v4 = vadd.f32 1.0, %v1866_v3 }
 0xbcb   :  { %1867 = vrcp.f32 %v519_v4 }
 0xbd5   :  { %v1868_v5 = vpop.eup %1867 }
 0xbd6   :  { %v534_v15 = vsub.f32 1.0, %v1868_v5  ;;  %v540_v62 = vmul.f32 %v1868_v5, %v467_v50 }
 0xc2e   :  { %v525_v7 = vpop.permute.xlu1 %524 }
 0xc2f   :  { %v527_v9 = vmul.f32 %v1868_v5, %v525_v7 }
 0xc31   :  { %529 = vrot.lane.b32.xlu0 %v527_v9, %s1910_s30 }
 0xca3   :  { %v530_v12 = vpop.permute.xlu0 %529 }
 0xca4   :  { %v532_v13 = vadd.f32 %v530_v12, %v141_v58 }
 0xca6   :  { %1869 = vtanh.f32 %v532_v13  ;;  %v152_v13 = vadd.f32 %v2031_v63, %v1998_v18  ;;  %v1831_v63 = vld [vmem:[%s2255_s3 + $0x28] sm:$0xff]  }
 0xcb0   :  { %v1870_v14 = vpop.eup %1869 }
 0xcb1   :  { %536 = vrot.lane.b32.xlu1 %v1870_v14, %s1911_s8 }
 0xd23   :  { %v537_v16 = vpop.permute.xlu1 %536 }
 0xd24   :  { %v539_v17 = vmul.f32 %v537_v16, %v534_v15 }
 0xd26   :  { %v541_v19 = vadd.f32 %v540_v62, %v539_v17 }
 0xd28   :  { %v542_v20 = vpack.c.bf16 %v541_v19, %v541_v19 }
 0xd2a   :  { %544 = vrot.lane.b32.xlu0 %v542_v20, %s1911_s8 }
 0xd9c   :  { %v545_v21 = vpop.permute.xlu0 %544 }
 0xd9d   :  { %1727 = vmatmul.mubr.msk.bf16.vlgmr.msra.gmra.mrb[12].mxu1 %vm167_vm2, %v545_v21 }
 0xd9e   :  { %1739 = vmatpush3.bf16.msra.mxu1 %v1953_v2  ;;  %1742 = vmatprep.mubr.msk.bf16.mxu1 %vm1908_vm0, %v1907_v0  ;;  %v144_v2 = vadd.f32 %v1998_v18, %v2033_v1  ;;  %v1832_v18 = vld [vmem:[%s2255_s3 + $0x18] sm:$0xff]  }
 0xd9f   :  { %1740 = vmatprep.subr.bf16.mxu1 %v1907_v0 }
 0xda2   :  { %1741 = vmatpush3.bf16.msra.mxu1 %v1967_v6 }
 0xda3   :  { %1752 = vmatprep.subr.bf16.mxu1 %v1907_v0 }
 0xe70   :  { %v583_v22 = vpop.f32.mrb[12].mxu1 }
 0xe71   :  { %v596_v23 = vadd.f32 %v583_v22, %v1989_v10  ;;  %v1728_v24 = vpop.f32.mrb[13].mxu1  ;;  %v589_v8 = vadd.f32 %v583_v22, %v144_v2  ;;  %v1830_v22 = vld [vmem:[%s2255_s3 + $0x20] sm:$0xff]  }
 0xe72   :  { %v586_v25 = vpop.f32.mrb[14].mxu1  ;;  %v21_v24 = vld [vmem:[%s2258_s1] sm:$0xff] }
 0xe73   :  { %598 = vrot.lane.b32.xlu1 %v596_v23, %s1910_s30  ;;  %v1729_v26 = vpop.f32.mrb[15].mxu1  ;;  %v1586_v27 = vmul.f32 -1.442695, %v589_v8  ;;  %v22_v25 = vld [vmem:[%s2258_s1 + $0x8] sm:$0xff] }
 0xe74   :  { %v775_v26 = vpack.c.bf16 %v22_v25, %v21_v24 }
 0xe75   :  { %1871 = vpow2.f32 %v1586_v27 }
 0xe7f   :  { %v1872_v28 = vpop.eup %1871 }
 0xe80   :  { %v593_v29 = vadd.f32 1.0, %v1872_v28 }
 0xe82   :  { %1873 = vrcp.f32 %v593_v29 }
 0xe8c   :  { %v1874_v6 = vpop.eup %1873 }
 0xe8d   :  { %v608_v35 = vsub.f32 1.0, %v1874_v6  ;;  %v614_v1 = vmul.f32 %v1874_v6, %v541_v19 }
 0xee5   :  { %v599_v30 = vpop.permute.xlu1 %598 }
 0xee6   :  { %v601_v31 = vmul.f32 %v1874_v6, %v599_v30 }
 0xee8   :  { %603 = vrot.lane.b32.xlu0 %v601_v31, %s1910_s30 }
 0xf5a   :  { %v604_v32 = vpop.permute.xlu0 %603 }
 0xf5b   :  { %v606_v33 = vadd.f32 %v604_v32, %v144_v2 }
 0xf5d   :  { %1875 = vtanh.f32 %v606_v33 }
 0xf67   :  { %v1876_v34 = vpop.eup %1875 }
 0xf68   :  { %610 = vrot.lane.b32.xlu1 %v1876_v34, %s1911_s8 }
 0xfda   :  { %v611_v36 = vpop.permute.xlu1 %610 }
 0xfdb   :  { %v613_v37 = vmul.f32 %v611_v36, %v608_v35  ;;  %v1833_v35 = vld [vmem:[%s2255_s3 + $0x60] sm:$0xff]   ;;  %v1834_v36 = vld [vmem:[%s2255_s3 + $0x68] sm:$0xff]  }
 0xfdd   :  { %v615_v38 = vadd.f32 %v614_v1, %v613_v37  ;;  %v1912_v1 = vmov 1966171168  }
 0xfde   :  { %v897_v37 = vunpack.c.l.s4 %v1912_v1 }
 0xfdf   :  { %v616_v39 = vpack.c.bf16 %v615_v38, %v615_v38 }
 0xfe1   :  { %618 = vrot.lane.b32.xlu0 %v616_v39, %s1911_s8  ;;  %v898_v39 = vunpack.c.0.s8 %v897_v37 }
0x1053   :  { %v619_v40 = vpop.permute.xlu0 %618 }
0x1054   :  { %1735 = vmatmul.mubr.msk.bf16.vlgmr.msra.gmra.mrb[16].mxu0 %vm167_vm2, %v619_v40 }
0x1055   :  { %1748 = vmatprep.mubr.msk.bf16.mxu0 %vm1908_vm0, %v1907_v0  ;;  %1747 = vmatpush3.bf16.msra.mxu0 %v1832_v18 }
0x1056   :  { %1760 = vmatprep.subr.bf16.mxu0 %v1907_v0 }
0x105c   :  { %1749 = vmatmul.mubr.msk.bf16.vlgmr.msra.gmra.mrb[20].mxu0 %vm77_vm1, %v775_v26 }
0x105d   :  { %1764 = vmatprep.mubr.msk.bf16.mxu0 %vm1908_vm0, %v1907_v0  ;;  %1761 = vmatpush3.bf16.msra.mxu0 %v1833_v35 }
0x105e   :  { %1762 = vmatprep.subr.bf16.mxu0 %v1907_v0 }
0x1061   :  { %1763 = vmatpush3.bf16.msra.mxu0 %v1834_v36 }
0x1062   :  { %1773 = vmatprep.subr.mxu0 %v1907_v0 }
0x1127   :  { %v657_v41 = vpop.f32.mrb[16].mxu0 }
0x1128   :  { %v670_v42 = vadd.f32 %v657_v41, %v1989_v10  ;;  %v1736_v43 = vpop.f32.mrb[17].mxu0  ;;  %v663_v47 = vadd.f32 %v657_v41, %v149_v46  ;;  %v1594_v41 = vld [vmem:[%s2257_s4 + $0x3] ss:$0 sm:$0xff] }
0x1129   :  { %v660_v44 = vpop.f32.mrb[18].mxu0  ;;  %v1591_v43 = vld [vmem:[%s2257_s4 + $0x2] ss:$0 sm:$0xff] }
0x112a   :  { %672 = vrot.lane.b32.xlu1 %v670_v42, %s1910_s30  ;;  %v1737_v45 = vpop.f32.mrb[19].mxu0  ;;  %v1588_v48 = vmul.f32 -1.442695, %v663_v47 }
0x112c   :  { %1877 = vpow2.f32 %v1588_v48 }
0x112f   :  { %v823_v31 = vpop.f32.mrb[20].mxu0 }
0x1130   :  { %v1750_v32 = vpop.f32.mrb[21].mxu0 }
0x1131   :  { %v826_v33 = vpop.f32.mrb[22].mxu0 }
0x1132   :  { %v1751_v34 = vpop.f32.mrb[23].mxu0 }
0x1136   :  { %v1878_v11 = vpop.eup %1877 }
0x1137   :  { %v667_v49 = vadd.f32 1.0, %v1878_v11  ;;  %v824_v11 = vadd.f32 %v1591_v43, %v823_v31 }
0x1139   :  { %1879 = vrcp.f32 %v667_v49 }
0x1143   :  { %v1880_v50 = vpop.eup %1879 }
0x1144   :  { %v682_v56 = vsub.f32 1.0, %v1880_v50  ;;  %v688_v61 = vmul.f32 %v1880_v50, %v615_v38  ;;  %v899_v38 = vlaneseq }
0x1146   :  { %v900_v40 = vshrl.u32 %v899_v38, 7 }
0x1148   :  { %v901_v45 = vsub.s32 %v898_v39, %v900_v40 }
0x119c   :  { %v673_v51 = vpop.permute.xlu1 %672 }
0x119d   :  { %v675_v52 = vmul.f32 %v1880_v50, %v673_v51  ;;  %v920_v51 = vsub.s32 0, %v900_v40 }
0x119f   :  { %677 = vrot.lane.b32.xlu0 %v675_v52, %s1910_s30 }
0x1211   :  { %v678_v53 = vpop.permute.xlu0 %677 }
0x1212   :  { %v680_v54 = vadd.f32 %v678_v53, %v149_v46 }
0x1214   :  { %1881 = vtanh.f32 %v680_v54  ;;  %v830_v54 = vmax.f32 %v824_v11, 0.0 }
0x121e   :  { %v1882_v55 = vpop.eup %1881 }
0x121f   :  { %684 = vrot.lane.b32.xlu1 %v1882_v55, %s1911_s8  ;;  %v827_v55 = vadd.f32 %v1591_v43, %v826_v33 }
0x1291   :  { %v685_v57 = vpop.permute.xlu1 %684 }
0x1292   :  { %v687_v58 = vmul.f32 %v685_v57, %v682_v56 }
0x1294   :  { %v689_v59 = vadd.f32 %v688_v61, %v687_v58  ;;  %v831_v58 = vmax.f32 %v827_v55, 0.0  ;;  %v1835_v55 = vld [vmem:[%s2255_s3 + $0x30] sm:$0xff]  }
0x1296   :  { %v690_v60 = vpack.c.bf16 %v689_v59, %v689_v59 }
0x1298   :  { %692 = vrot.lane.b32.xlu0 %v690_v60, %s1911_s8 }
0x130a   :  { %v693_v3 = vpop.permute.xlu0 %692 }
0x130b   :  { %1743 = vmatmul.mubr.msk.bf16.vlgmr.msra.gmra.mrb[16].mxu1 %vm167_vm2, %v693_v3 }
0x130c   :  { %1756 = vmatprep.mubr.msk.bf16.mxu1 %vm1908_vm0, %v1907_v0  ;;  %1753 = vmatpush3.bf16.msra.mxu1 %v1830_v22 }
0x130d   :  { %1754 = vmatprep.subr.bf16.mxu1 %v1907_v0 }
0x1310   :  { %1755 = vmatpush3.bf16.msra.mxu1 %v1831_v63 }
0x1311   :  { %1768 = vmatprep.subr.mxu1 %v1907_v0 }
0x13de   :  { %v731_v4 = vpop.f32.mrb[16].mxu1 }
0x13df   :  { %v744_v5 = vadd.f32 %v731_v4, %v1989_v10  ;;  %v1744_v7 = vpop.f32.mrb[17].mxu1  ;;  %v737_v14 = vadd.f32 %v731_v4, %v152_v13  ;;  %v28_v4 = vld [vmem:[%s2257_s4 + $0x4] sm:$0x1] }
0x13e0   :  { %v734_v9 = vpop.f32.mrb[18].mxu1  ;;  %1806 = vpush %v28_v4 }
0x13e1   :  { %746 = vrot.lane.b32.xlu1 %v744_v5, %s1910_s30  ;;  %v1745_v12 = vpop.f32.mrb[19].mxu1  ;;  %v1590_v15 = vmul.f32 -1.442695, %v737_v14  ;;  %v2164_v14 = vand.u32 127, %v899_v38 }
0x13e3   :  { %1883 = vpow2.f32 %v1590_v15  ;;  %v992_v15 = vand.u32 7, %v900_v40  ;;  %vm1540_vm10 = vcmp.eq.s32.totalorder %v2164_v14, 0 }
0x13e5   :  { %vm994_vm3 = vcmp.eq.s32.totalorder %v992_v15, %v2164_v14 }
0x13ed   :  { %v1884_v16 = vpop.eup %1883 }
0x13ee   :  { %v741_v62 = vadd.f32 1.0, %v1884_v16 }
0x13f0   :  { %1885 = vrcp.f32 %v741_v62  ;;  %v1601_v62 = vsel %vm994_vm3, 1.0, %v1907_v0 }
0x13fa   :  { %v1886_v17 = vpop.eup %1885 }
0x13fb   :  { %v756_v2 = vsub.f32 1.0, %v1886_v17  ;;  %v762_v27 = vmul.f32 %v1886_v17, %v689_v59 }
0x1411   :  { %s1807_s6 = spop %1806 }
0x1453   :  { %v747_v19 = vpop.permute.xlu1 %746 }
0x1454   :  { %v749_v20 = vmul.f32 %v1886_v17, %v747_v19 }
0x1456   :  { %751 = vrot.lane.b32.xlu0 %v749_v20, %s1910_s30 }
0x14c8   :  { %v752_v10 = vpop.permute.xlu0 %751 }
0x14c9   :  { %v754_v21 = vadd.f32 %v752_v10, %v152_v13  ;;  %v989_v13 = vadd.s32 8, %v900_v40 }
0x14cb   :  { %1887 = vtanh.f32 %v754_v21  ;;  %v993_v16 = vand.u32 7, %v989_v13 }
0x14cd   :  { %vm995_vm4 = vcmp.eq.s32.totalorder %v993_v16, %v2164_v14 }
0x14ce   :  { %v1602_v19 = vsel %vm995_vm4, 1.0, %v1907_v0 }
0x14d5   :  { %v1888_v23 = vpop.eup %1887 }
0x14d6   :  { %758 = vrot.lane.b32.xlu1 %v1888_v23, %s1911_s8 }
0x1548   :  { %v759_v8 = vpop.permute.xlu1 %758 }
0x1549   :  { %v761_v28 = vmul.f32 %v759_v8, %v756_v2 }
0x154b   :  { %v2131_v29 = vadd.f32 %v762_v27, %v761_v28 }
0x154d   :  { %v764_v6 = vpack.c.bf16 %v2131_v29, %v2131_v29  ;;  %v1350_v38 = vrot.slane %v2131_v29, 6 }
0x154f   :  { %837 = vrot.lane.b32.xlu0 %v764_v6, %s1911_s8  ;;  %v1029_v6 = vstv %s1807_s6 }
0x15c1   :  { %v2136_v30 = vpop.permute.xlu0 %837 }
0x15c2   :  { %1757 = vmatmul.mubr.msk.bf16.vlgmr.msra.gmra.mrb[20].mxu1 %vm167_vm2, %v2136_v30 }
0x15c3   :  { %1769 = vmatpush3.msra.mxu1 %v21_v24  ;;  %1770 = vmatprep.mubr.msk.f32.mxu1 %vm1908_vm0, %v1907_v0 }
0x15c4   :  { %1778 = vmatprep.subr.bf16.mxu1 %v1907_v0 }
0x1695   :  { %v888_v42 = vpop.f32.mrb[20].mxu1 }
0x1696   :  { %v889_v44 = vadd.f32 %v1594_v41, %v888_v42  ;;  %v1758_v46 = vpop.f32.mrb[21].mxu1 }
0x1697   :  { %v891_v47 = vpop.f32.mrb[22].mxu1 }
0x1698   :  { %v894_v48 = vmax.f32 %v889_v44, 0.0  ;;  %v1759_v49 = vpop.f32.mrb[23].mxu1 }
0x169a   :  { %v902_v50 = vrot.slane %v894_v48, %v901_v45 }
0x169c   :  { %v903_v52 = vcombine.high %v902_v50, %v902_v50  ;;  %v910_v53 = vrot.slane %v902_v50, %v901_v45 }
0x169e   :  { %v921_v56 = vrot.slane %v910_v53, %v920_v51  ;;  %v917_v57 = vrot.slane %v903_v52, %v901_v45  ;;  %v23_v45 = vld [vmem:[%s2259_s2] sm:$0x3] }
0x169f   :  { %v1047_v46 = vrot.slane %v23_v45, 1 }
0x16a0   :  { %v928_v61 = vmul.f32 %v921_v56, %v830_v54  ;;  %v925_v59 = vrot.slane %v917_v57, %v920_v51 }
0x16a2   :  { %v929_v60 = vmul.f32 %v925_v59, %v831_v58  ;;  %v1836_v58 = vld [vmem:[%s2255_s3 + $0x38] sm:$0xff]  }
0x16a4   :  { %v930_v3 = vpack.c.bf16 %v929_v60, %v928_v61 }
0x16a6   :  { %1765 = vmatmul.mubr.msk.bf16.vlgmr.msra.gmra.mrb[24].mxu0 %vm167_vm2, %v930_v3  ;;  %v1837_v3 = vld [vmem:[%s2255_s3 + $0x40] sm:$0xff]  }
0x16a7   :  { %1774 = vmatpush3.msra.mxu0 %v22_v25  ;;  %1775 = vmatprep.mubr.msk.f32.mxu0 %vm1908_vm0, %v1907_v0 }
0x16a8   :  { %1786 = vmatprep.subr.bf16.mxu0 %v1907_v0 }
0x1779   :  { %v980_v5 = vpop.f32.mrb[24].mxu0 }
0x177a   :  { %1002 = vperm.xlu1 %1821, %v980_v5   ;;  %v1766_v7 = vpop.f32.mrb[25].mxu0 }
0x177b   :  { %v983_v9 = vpop.f32.mrb[26].mxu0 }
0x177c   :  { %1007 = vperm.xlu0 %1822, %v983_v9   ;;  %v1767_v12 = vpop.f32.mrb[27].mxu0 }
0x17f9   :  { %v1003_v17 = vpop.permute.xlu1 %1002 }
0x17fa   :  { %v1010_v20 = vmul.f32 %v1601_v62, %v1003_v17 }
0x17fb   :  { %v1008_v10 = vpop.permute.xlu0 %1007 }
0x17fc   :  { %v1013_v21 = vsel %vm1012_vm5, %v1010_v20, 0.0  ;;  %v1011_v22 = vmul.f32 %v1602_v19, %v1008_v10 }
0x17fd   :  { %v1014_v18 = vrot.slane %v1013_v21, 4 }
0x17fe   :  { %v1020_v63 = vsel %vm1012_vm5, %v1011_v22, 0.0  ;;  %v1838_v22 = vld [vmem:[%s2255_s3 + $0x48] sm:$0xff]  }
0x17ff   :  { %v1015_v23 = vadd.f32 %v1014_v18, %v1013_v21  ;;  %v1021_v24 = vrot.slane %v1020_v63, 4  ;;  %v1839_v18 = vld [vmem:[%s2255_s3 + $0x50] sm:$0xff]  }
0x1801   :  { %v1016_v25 = vrot.slane %v1015_v23, 2  ;;  %v1022_v26 = vadd.f32 %v1021_v24, %v1020_v63  ;;  %v1605_v63 = vld [vmem:[%s2257_s4 + $0x5] ss:$0 sm:$0xff] }
0x1803   :  { %v1023_v2 = vrot.slane %v1022_v26, 2  ;;  %v1017_v8 = vadd.f32 %v1016_v25, %v1015_v23  ;;  %v1609_v23 = vld [vmem:[%s2257_s4 + $0x6] ss:$0 sm:$0xff] }
0x1805   :  { %v1018_v27 = vrot.slane %v1017_v8, 1  ;;  %v1024_v28 = vadd.f32 %v1023_v2, %v1022_v26 }
0x1807   :  { %v1019_v31 = vadd.f32 %v1018_v27, %v1017_v8  ;;  %v1025_v32 = vrot.slane %v1024_v28, 1 }
0x1809   :  { %v1026_v33 = vadd.f32 %v1025_v32, %v1024_v28  ;;  %v1031_v34 = vadd.f32 %v1029_v6, %v1019_v31 }
0x180b   :  { %v1032_v35 = vadd.f32 %v1029_v6, %v1026_v33  ;;  %v1033_v36 = vsel %vm1012_vm5, %v1031_v34, -inf }
0x180d   :  { %v1034_v1 = vsel %vm1012_vm5, %v1032_v35, -inf }
0x180e   :  { %v1035_v37 = vmax.f32 %v1033_v36, %v1034_v1  ;;  %v1612_v36 = vld [vmem:[%s2257_s4 + $0x7] ss:$0 sm:$0xff] }
0x1810   :  { %1036 = vmax.xlane.f32.xlu1 %v1035_v37 }
0x1821   :  { %1351 = vrot.lane.b32.xlu1 %v1350_v38, %s1911_s8 }
0x189d   :  { %v1037_v39 = vpop.xlane.xlu1 %1036 }
0x189e   :  { %1808 = vpush %v1037_v39 }
0x18a1   :  { %v1352_v32 = vpop.permute.xlu1 %1351 }
0x18cf   :  { %s1809_s7 = spop %1808 }
0x18d0   :  { %v1039_v40 = vstv %s1809_s7 }
0x18d1   :  { %v1040_v41 = vsub.f32 %v1031_v34, %v1039_v40  ;;  %v1041_v42 = vsub.f32 %v1032_v35, %v1039_v40  ;;  %v1840_v35 = vld [vmem:[%s2255_s3 + $0x58] sm:$0xff]  }
0x18d3   :  { %v1042_v43 = vmul.f32 1.442695, %v1040_v41  ;;  %v1044_v44 = vmul.f32 1.442695, %v1041_v42 }
0x18d5   :  { %1889 = vpow2.f32 %v1042_v43 }
0x18d6   :  { %1891 = vpow2.f32 %v1044_v44 }
0x18df   :  { %v1890_v47 = vpop.eup %1889 }
0x18e0   :  { %v1892_v48 = vpop.eup %1891  ;;  %v1050_v11 = vmul.f32 %v1890_v47, %v23_v45 }
0x18e1   :  { %v1051_v29 = vmul.f32 %v1892_v48, %v1047_v46 }
0x18e3   :  { %v1054_v49 = vrot.slane %v1051_v29, 7 }
0x18e5   :  { %v1056_v50 = vsel %vm1055_vm6, %v1054_v49, %v1050_v11 }
0x18e6   :  { %v1059_v51 = vsel %vm1058_vm7, %v1056_v50, 0.0 }
0x18e7   :  { %1060 = vadd.xlane.f32.xlu0 %v1059_v51 }
0x1974   :  { %v1061_v52 = vpop.xlane.xlu0 %1060 }
0x1975   :  { %v1062_v53 = vadd.f32 1e-05, %v1061_v52 }
0x1977   :  { %1893 = vrcp.f32 %v1062_v53 }
0x1981   :  { %v1894_v54 = vpop.eup %1893 }
0x1982   :  { %v1065_v56 = vrot.slane %v1894_v54, 1  ;;  %v1068_v57 = vmul.f32 %v1894_v54, %v1050_v11  ;;  %v1416_v54 = vld [vmem:[%s2259_s2 + $0x4] sm:$0x3] }
0x1984   :  { %1771 = vmatmul.mubr.msk.f32.vlgmr.msra.gmra.mrb[24].mxu1 %vm1012_vm5, %v1068_v57  ;;  %v1069_v61 = vmul.f32 %v1065_v56, %v1051_v29 }
0x1985   :  { %1779 = vmatpush3.bf16.msra.mxu1 %v1835_v55  ;;  %1782 = vmatprep.mubr.msk.bf16.mxu1 %vm1908_vm0, %v1907_v0 }
0x1986   :  { %1776 = vmatmul.mubr.msk.f32.vlgmr.msra.gmra.mrb[28].mxu0 %vm1012_vm5, %v1069_v61  ;;  %v1546_v59 = vrot.slane %v1069_v61, 7  ;;  %1780 = vmatprep.subr.bf16.mxu1 %v1907_v0 }
0x1987   :  { %1788 = vmatprep.mubr.msk.bf16.mxu0 %vm1908_vm0, %v1907_v0  ;;  %1787 = vmatpush3.bf16.msra.mxu0 %v1837_v3 }
0x1988   :  { %v2194_v60 = vsel %vm1055_vm6, %v1546_v59, %v1068_v57  ;;  %1792 = vmatprep.subr.bf16.mxu0 %v1907_v0 }
0x1989   :  { %1781 = vmatpush3.bf16.msra.mxu1 %v1836_v58 }
0x198a   :  { %1800 = vmatprep.subr.bf16.mxu1 %v1907_v0 }
0x198c   :  { %1783 = vmatmul.mubr.msk.bf16.vlgmr.msra.gmra.mrb[28].mxu1 %vm167_vm2, %v2136_v30 }
0x198d   :  { %1802 = vmatprep.mubr.msk.bf16.mxu1 %vm1908_vm0, %v1907_v0  ;;  %1801 = vmatpush3.bf16.msra.mxu1 %v1840_v35 }
0x1a57   :  { %v1139_v4 = vpop.f32.mrb[24].mxu1 }
0x1a58   :  { %v1772_v5 = vpop.f32.mrb[25].mxu1  ;;  %v1281_v9 = vpack.c.bf16 %v1139_v4, %v1139_v4 }
0x1a59   :  { %v1212_v7 = vpop.f32.mrb[28].mxu0 }
0x1a5a   :  { %v1282_v12 = vpack.c.bf16 %v1212_v7, %v1212_v7  ;;  %v1777_v13 = vpop.f32.mrb[29].mxu0  ;;  %v1289_v16 = vunpack.c.l.b16 %v1281_v9 }
0x1a5b   :  { %v1616_v13 = vld [vmem:[%s2257_s4 + $0x8] ss:$0 sm:$0xff] }
0x1a5c   :  { %v1290_v15 = vunpack.c.l.b16 %v1282_v12 }
0x1a5e   :  { %v1291_v62 = vrot.slane %v1290_v15, 7 }
0x1a5f   :  { %v1274_v30 = vpop.f32.mrb[28].mxu1 }
0x1a60   :  { %v1292_v17 = vsel %vm1055_vm6, %v1291_v62, %v1289_v16  ;;  %v1784_v19 = vpop.f32.mrb[29].mxu1  ;;  %v1275_v24 = vadd.f32 %v1605_v63, %v1274_v30 }
0x1a61   :  { %v1293_v20 = vpack.c.b16 %v1292_v17, %v1292_v17  ;;  %v1277_v10 = vpop.f32.mrb[30].mxu1 }
0x1a62   :  { %v1785_v21 = vpop.f32.mrb[31].mxu1  ;;  %v1280_v27 = vmax.f32 %v1275_v24, 0.0 }
0x1a63   :  { %1789 = vmatmul.mubr.msk.bf16.vlgmr.msra.gmra.mrb[32].mxu0 %vm77_vm1, %v1293_v20 }
0x1a64   :  { %1796 = vmatprep.mubr.msk.bf16.mxu0 %vm1908_vm0, %v1907_v0  ;;  %1793 = vmatpush3.bf16.msra.mxu0 %v1838_v22 }
0x1a65   :  { %1794 = vmatprep.subr.bf16.mxu0 %v1907_v0 }
0x1a68   :  { %1795 = vmatpush3.bf16.msra.mxu0 %v1839_v18 }
0x1b36   :  { %v1337_v25 = vpop.f32.mrb[32].mxu0 }
0x1b37   :  { %v1338_v26 = vadd.f32 %v1609_v23, %v1337_v25  ;;  %v1790_v2 = vpop.f32.mrb[33].mxu0 }
0x1b38   :  { %v1340_v8 = vpop.f32.mrb[34].mxu0 }
0x1b39   :  { %v1343_v28 = vmax.f32 %v1338_v26, 0.0  ;;  %v1791_v6 = vpop.f32.mrb[35].mxu0 }
0x1b3b   :  { %v1344_v31 = vmul.f32 %v1343_v28, %v1280_v27 }
0x1b3d   :  { %v1355_v33 = vsel %vm1354_vm8, %v1344_v31, %v1352_v32 }
0x1b3e   :  { %v1356_v34 = vpack.c.bf16 %v1355_v33, %v1355_v33 }
0x1b40   :  { %1797 = vmatmul.mubr.msk.bf16.vlgmr.msra.gmra.mrb[36].mxu0 %vm167_vm2, %v1356_v34 }
0x1c13   :  { %v1410_v1 = vpop.f32.mrb[36].mxu0 }
0x1c14   :  { %v2230_v37 = vadd.f32 %v1612_v36, %v1410_v1  ;;  %v1798_v38 = vpop.f32.mrb[37].mxu0  ;;  %v1549_v36 = vsel %vm1012_vm5, %v2194_v60, 0.0  ;;  %v1620_v1 = vsel %vm1540_vm10, 1.0, %v1907_v0 }
0x1c15   :  { %v1413_v39 = vpop.f32.mrb[38].mxu0 }
0x1c16   :  { %v1619_v40 = vmul.f32 -1.442695, %v2230_v37  ;;  %v1799_v41 = vpop.f32.mrb[39].mxu0  ;;  %v1419_v42 = vpack.c.bf16 %v2230_v37, %v2230_v37  ;;  %v1545_v38 = vsel %vm77_vm1, %v2230_v37, 0.0 }
0x1c18   :  { %1895 = vpow2.f32 %v1619_v40  ;;  %v1425_v43 = vrot.slane %v1419_v42, 1  ;;  %v1551_v40 = vrot.slane %v1549_v36, 6 }
0x1c1a   :  { %1426 = vrot.lane.b32.xlu0 %v1425_v43, %s1913_s26  ;;  %v1553_v42 = vsel %vm1354_vm8, %v1545_v38, %v1551_v40 }
0x1c22   :  { %v1896_v44 = vpop.eup %1895 }
0x1c23   :  { %v1480_v45 = vadd.f32 1.0, %v1896_v44 }
0x1c25   :  { %1897 = vrcp.f32 %v1480_v45 }
0x1c2f   :  { %v1898_v46 = vpop.eup %1897 }
0x1c30   :  { %v1484_v47 = vrot.slane %v1898_v46, 2 }
0x1c32   :  { %1485 = vrot.lane.b32.xlu1 %v1484_v47, %s1913_s26 }
0x1c8c   :  { %v1427_v48 = vpop.permute.xlu0 %1426 }
0x1c8d   :  { %1803 = vmatmul.mubr.msk.bf16.vlgmr.msra.gmra.mrb[32].mxu1 %vm77_vm1, %v1427_v48 }
0x1ca4   :  { %v1486_v29 = vpop.permute.xlu1 %1485 }
0x1ca5   :  { %v1488_v11 = vmul.f32 %v1486_v29, %v2230_v37 }
0x1ca7   :  { %v1492_v49 = vand.u32 2147483647, %v1488_v11  ;;  %v1489_v55 = vmax.f32 %v1488_v11, 0.0  ;;  %v1490_v56 = vmul.f32 %v1488_v11, %v1416_v54 }
0x1ca9   :  { %v1493_v50 = vsub.f32 0.0, %v1492_v49  ;;  %v1491_v61 = vsub.f32 %v1489_v55, %v1490_v56 }
0x1cab   :  { %v1494_v51 = vmul.f32 1.442695, %v1493_v50 }
0x1cad   :  { %1899 = vpow2.f32 %v1494_v51 }
0x1cb7   :  { %v1900_v52 = vpop.eup %1899 }
0x1cb8   :  { %v1496_v53 = vadd.f32 1.0, %v1900_v52 }
0x1cba   :  { %1901 = vlog2.f32 %v1496_v53 }
0x1cc4   :  { %v1902_v57 = vpop.eup %1901 }
0x1cc5   :  { %v1498_v58 = vmul.f32 0.6931472, %v1902_v57 }
0x1cc7   :  { %v1499_v59 = vadd.f32 %v1498_v58, %v1491_v61 }
0x1cc9   :  { %v1501_v3 = vsel %vm1500_vm9, %v1499_v59, 0.0 }
0x1cca   :  { %1502 = vadd.xlane.f32.xlu1 %v1501_v3 }
0x1d57   :  { %v1503_v4 = vpop.xlane.xlu1 %1502 }
0x1d58   :  { %v1504_v5 = vrot.slane %v1503_v4, 4 }
0x1d5a   :  { %v1505_v7 = vadd.f32 %v1504_v5, %v1503_v4 }
0x1d5c   :  { %v1506_v9 = vrot.slane %v1505_v7, 2 }
0x1d5e   :  { %v1507_v12 = vadd.f32 %v1506_v9, %v1505_v7 }
0x1d60   :  { %v1471_v15 = vpop.f32.mrb[32].mxu1  ;;  %v1508_v16 = vrot.slane %v1507_v12, 1 }
0x1d61   :  { %v1472_v62 = vadd.f32 %v1616_v13, %v1471_v15  ;;  %v1804_v30 = vpop.f32.mrb[33].mxu1 }
0x1d62   :  { %v1474_v17 = vpop.f32.mrb[34].mxu1  ;;  %v1509_v19 = vadd.f32 %v1508_v16, %v1507_v12 }
0x1d63   :  { %v1517_v20 = vand.u32 2147483647, %v1472_v62  ;;  %v1805_v10 = vpop.f32.mrb[35].mxu1  ;;  %v1514_v23 = vmax.f32 %v1472_v62, 0.0  ;;  %v1515_v24 = vmul.f32 %v1472_v62, %v1416_v54 }
0x1d64   :  { %1810 = vpush %v1509_v19 }
0x1d65   :  { %v1518_v21 = vsub.f32 0.0, %v1517_v20  ;;  %v1516_v26 = vsub.f32 %v1514_v23, %v1515_v24 }
0x1d67   :  { %v1519_v22 = vmul.f32 1.442695, %v1518_v21 }
0x1d69   :  { %1903 = vpow2.f32 %v1519_v22 }
0x1d73   :  { %v1904_v18 = vpop.eup %1903 }
0x1d74   :  { %v1521_v63 = vadd.f32 1.0, %v1904_v18 }
0x1d76   :  { %1905 = vlog2.f32 %v1521_v63 }
0x1d80   :  { %v1906_v25 = vpop.eup %1905 }
0x1d81   :  { %v1523_v2 = vmul.f32 0.6931472, %v1906_v25 }
0x1d83   :  { %v1524_v8 = vadd.f32 %v1523_v2, %v1516_v26 }
0x1d85   :  { %v1525_v27 = vsel %vm1500_vm9, %v1524_v8, 0.0 }
0x1d86   :  { %1526 = vadd.xlane.f32.xlu0 %v1525_v27 }
0x1d95   :  { %s1811_s2 = spop %1810 }
0x1d96   :  { %s1513_s4 = smul.f32 0.03125, %s1811_s2 }
0x1e13   :  { %v1527_v28 = vpop.xlane.xlu0 %1526 }
0x1e14   :  { %v1528_v6 = vrot.slane %v1527_v28, 4 }
0x1e16   :  { %v1529_v31 = vadd.f32 %v1528_v6, %v1527_v28 }
0x1e18   :  { %v1530_v32 = vrot.slane %v1529_v31, 2 }
0x1e1a   :  { %v1531_v33 = vadd.f32 %v1530_v32, %v1529_v31 }
0x1e1c   :  { %v1532_v34 = vrot.slane %v1531_v33, 1 }
0x1e1e   :  { %v1533_v35 = vadd.f32 %v1532_v34, %v1531_v33 }
0x1e20   :  { %1812 = vpush %v1533_v35 }
0x1e51   :  { %s1813_s30 = spop %1812 }
0x1e52   :  { %s1537_s6 = smul.f32 0.03125, %s1813_s30 }
0x1e54   :  { %s1538_s7 = sadd.f32 %s1537_s6, %s1513_s4 }
0x1e56   :  { %s1539_s9 = smul.f32 16.0, %s1538_s7 }
0x1e58   :  { %v1543_v39 = vstv %s1539_s9 }
0x1e59   :  { %v1544_v41 = vmul.f32 %v1620_v1, %v1543_v39 }
0x1e5b   :  { %v1555_v43 = vsel %vm1554_vm11, %v1553_v42, %v1544_v41 }
0x1e5c   :  { %v1557_v44 = vsel %vm1556_vm12, %v1555_v43, 0.0 }
0x1e5d   :  { %1558 = vst [vmem:[%s2260_s5] sm:$0xff] %v1557_v44 }

</bundles_post_ra>
